<compile_context>
chip_gen: v5e
topology: v5e:2x2
jax: 0.10.0
libtpu: 0.0.40
codegen_flags: <defaults>
</compile_context>

<pallas_src>
import functools

import jax
import jax.numpy as jnp
from jax import lax
from jax.experimental import pallas as pl
from jax.experimental.pallas import tpu as pltpu


def _round_up(x, m):
    return ((x + m - 1) // m) * m


# ------------- kernel 1: batched (non-recurrent) gate projection -------------
def _gates_kernel(x_ref,      # (TM, F)    f32  flattened per-timestep volumes
                  wf_ref,     # (F, 512)   bf16 backbone stand-in weight
                  bf_ref,     # (1, 512)   f32
                  wcomb_ref,  # (512, 4H)  bf16 folded (Wlc @ W_ih)
                  bcomb_ref,  # (1, 4H)    f32  folded (blc @ W_ih + biav)
                  gx_ref):    # (TM, 4H)   f32  out: x-side gate pre-activations
    # Cast the input tile to bf16 in VMEM (hides under the MXU); halves x HBM
    # traffic vs. a host-side cast pass.
    x_b = x_ref[...].astype(jnp.bfloat16)
    feat = jnp.dot(x_b, wf_ref[...],
                   preferred_element_type=jnp.float32) + bf_ref[...]
    a = jnp.maximum(feat, 0.0).astype(jnp.bfloat16)   # Dropout(eval) -> ReLU
    gx_ref[...] = jnp.dot(a, wcomb_ref[...],
                          preferred_element_type=jnp.float32) + bcomb_ref[...]


# ------------- kernel 2: sequential LSTM recurrence + tail head --------------
def _recurrent_kernel(gx_ref,     # (T_BLK, bs, 4H) f32 time-major gate pre-acts
                      whh_ref,    # (H, 4H)  bf16
                      wtail_ref,  # (1, H)   f32 (row vector)
                      btail_ref,  # (1, 1)   f32
                      out_ref,    # (bs, 1)  f32
                      h_ref,      # VMEM scratch (bs, H) f32
                      c_ref,      # VMEM scratch (bs, H) f32
                      *, hidden, seq_len, t_blk, needs_mask):
    blk = pl.program_id(0)

    @pl.when(blk == 0)
    def _init():
        h_ref[...] = jnp.zeros_like(h_ref)
        c_ref[...] = jnp.zeros_like(c_ref)

    def step(i, carry):
        # bf16 MXU operands (f32 accumulation); h/c state stays f32.
        gates = gx_ref[i] + jnp.dot(h_ref[...].astype(jnp.bfloat16),
                                    whh_ref[...],
                                    preferred_element_type=jnp.float32)
        # gate chunk order per the module: (f, i, o, c)
        sig = jax.nn.sigmoid(gates[:, :3 * hidden])   # one EUP launch for f,i,o
        g_t = jnp.tanh(gates[:, 3 * hidden:])
        f_t = sig[:, 0 * hidden:1 * hidden]
        i_t = sig[:, 1 * hidden:2 * hidden]
        o_t = sig[:, 2 * hidden:3 * hidden]
        c_new = f_t * c_ref[...] + i_t * g_t
        h_new = o_t * jnp.tanh(c_new)
        if needs_mask:                    # only when seq was padded to T_BLK
            valid = (blk * t_blk + i) < seq_len
            c_ref[...] = jnp.where(valid, c_new, c_ref[...])
            h_ref[...] = jnp.where(valid, h_new, h_ref[...])
        else:
            c_ref[...] = c_new
            h_ref[...] = h_new
        return carry

    # Partial unroll: LLO scheduling visibility without code-size blowup.
    lax.fori_loop(0, t_blk, step, 0, unroll=8)

    @pl.when(blk == pl.num_programs(0) - 1)
    def _finalize():
        # tail: Dropout(eval) -> ReLU -> Linear(H, 1) as a VPU reduction
        # (avoids a 1-lane-output MXU matmul / masked store).
        h_relu = jnp.maximum(h_ref[...], 0.0)
        out_ref[...] = (jnp.sum(h_relu * wtail_ref[...], axis=-1, keepdims=True)
                        + btail_ref[...])


# --------------------------------- wrapper -----------------------------------
@functools.partial(jax.jit, static_argnames=("hidden",))
def maru_l0_cox_forward(x, params, *, hidden):
    """x: (bs, seq, 1, D, H, W) float32 -> (bs, 1) float32."""
    (wf, bf, wlc, blc, wih, whh, biav, wtail, btail) = params
    bs, seq = x.shape[0], x.shape[1]
    feat_in = x.shape[2] * x.shape[3] * x.shape[4] * x.shape[5]
    feat_mid = wf.shape[1]        # 512
    four_h = 4 * hidden

    # ---- fold the two back-to-back linears (exact: no nonlinearity between) -
    hi = functools.partial(jnp.dot, precision=lax.Precision.HIGHEST)
    wcomb = hi(wlc, wih)                      # (512, 4H) f32
    bcomb = hi(blc, wih) + biav               # (1, 4H)   f32
    wf_b = wf.astype(jnp.bfloat16)
    wcomb_b = wcomb.astype(jnp.bfloat16)
    whh_b = whh.astype(jnp.bfloat16)

    # ---- stage 1: one batched matmul chain over all bs*seq rows -------------
    m = bs * seq
    m_pad = _round_up(m, 8)
    x_flat = x.reshape(m, feat_in)            # free reshape, no transpose, f32
    if m_pad != m:                            # rare: only to satisfy sublane=8
        x_flat = jnp.pad(x_flat, ((0, m_pad - m), (0, 0)))

    # Row tile: largest divisor of m_pad (no ragged-tile padding), preferring
    # >=2 grid tiles (so v7x's 2nd TensorCore gets work), under a VMEM budget.
    def _vmem_est(t):
        return (2 * (t * feat_in * 4 + t * four_h * 4)
                + 2 * (feat_in * feat_mid * 2 + feat_mid * four_h * 2
                       + (feat_mid + four_h) * 4))
    cands = [c for c in (512, 256, 128, 64, 32, 16, 8) if m_pad % c == 0]
    fits = [c for c in cands if _vmem_est(c) <= 24 * 1024 * 1024]
    pool = fits if fits else cands
    multi = [c for c in pool if m_pad // c >= 2]
    tm = (multi or pool)[0]

    full2 = lambda i: (0, 0)
    cost1 = pl.CostEstimate(
        flops=2 * m_pad * (feat_in * feat_mid + feat_mid * four_h),
        transcendentals=0,
        bytes_accessed=(m_pad * feat_in * 4 + feat_in * feat_mid * 2
                        + feat_mid * four_h * 2
                        + (feat_mid + four_h) * 4 + m_pad * four_h * 4))

    gates_flat = pl.pallas_call(
        _gates_kernel,
        out_shape=jax.ShapeDtypeStruct((m_pad, four_h), jnp.float32),
        grid_spec=pltpu.PrefetchScalarGridSpec(
            num_scalar_prefetch=0,
            grid=(m_pad // tm,),
            in_specs=[
                pl.BlockSpec((tm, feat_in), lambda i: (i, 0)),
                pl.BlockSpec(wf_b.shape, full2),
                pl.BlockSpec(bf.shape, full2),
                pl.BlockSpec(wcomb_b.shape, full2),
                pl.BlockSpec(bcomb.shape, full2),
            ],
            out_specs=pl.BlockSpec((tm, four_h), lambda i: (i, 0)),
        ),
        compiler_params=pltpu.CompilerParams(
            dimension_semantics=("parallel",)),   # independent row tiles
        cost_estimate=cost1,
    )(x_flat, wf_b, bf, wcomb_b, bcomb)

    # Only the small (bs, seq, 4H) gate tensor is transposed to time-major
    # (one tiny pass; keeps the recurrent load a clean leading-dim index).
    gates_valid = gates_flat if m_pad == m else gates_flat[:m]
    gates_tb = jnp.transpose(gates_valid.reshape(bs, seq, four_h), (1, 0, 2))

    # ---- stage 2: sequential recurrence, T_BLK timesteps per grid step ------
    t_cands = [c for c in (256, 128, 64, 32, 16, 8) if c <= seq and seq % c == 0]
    t_blk = t_cands[0] if t_cands else min(seq, 128)
    seq_pad = _round_up(seq, t_blk)
    needs_mask = seq_pad != seq
    if needs_mask:
        gates_tb = jnp.pad(gates_tb, ((0, seq_pad - seq), (0, 0), (0, 0)))

    wtail_row = wtail.reshape(1, hidden)
    cost2 = pl.CostEstimate(
        flops=2 * seq_pad * bs * hidden * four_h + 12 * seq_pad * bs * hidden,
        transcendentals=5 * seq_pad * bs * hidden,
        bytes_accessed=seq_pad * bs * four_h * 4 + hidden * four_h * 2 + bs * 4)

    kernel = functools.partial(_recurrent_kernel, hidden=hidden, seq_len=seq,
                               t_blk=t_blk, needs_mask=needs_mask)
    return pl.pallas_call(
        kernel,
        out_shape=jax.ShapeDtypeStruct((bs, 1), jnp.float32),
        grid_spec=pltpu.PrefetchScalarGridSpec(
            num_scalar_prefetch=0,
            grid=(seq_pad // t_blk,),
            in_specs=[
                pl.BlockSpec((t_blk, bs, four_h), lambda b: (b, 0, 0)),
                pl.BlockSpec(whh_b.shape, full2),
                pl.BlockSpec(wtail_row.shape, full2),
                pl.BlockSpec(btail.shape, full2),
            ],
            out_specs=pl.BlockSpec((bs, 1), full2),
            scratch_shapes=[
                pltpu.VMEM((bs, hidden), jnp.float32),   # h_t carried across grid
                pltpu.VMEM((bs, hidden), jnp.float32),   # c_t carried across grid
            ],
        ),
        compiler_params=pltpu.CompilerParams(
            dimension_semantics=("arbitrary",)),         # recurrent -> sequential
        cost_estimate=cost2,
    )(gates_tb, whh_b, wtail_row, btail)


# --------------------------- pure-JAX reference -------------------------------
def reference_forward(x, params, hidden):
    (wf, bf, wlc, blc, wih, whh, biav, wtail, btail) = params
    bs, seq = x.shape[0], x.shape[1]
    feat_in = x.shape[2] * x.shape[3] * x.shape[4] * x.shape[5]
    xf = x.reshape(bs, seq, feat_in)
    hi = functools.partial(lax.dot, precision=lax.Precision.HIGHEST)
    # Mirror the kernel's weight folding and bf16 rounding of MXU operands
    # (f32 accumulation everywhere).
    wcomb = jnp.dot(wlc, wih, precision=lax.Precision.HIGHEST)
    bcomb = jnp.dot(blc, wih, precision=lax.Precision.HIGHEST) + biav
    wf32 = wf.astype(jnp.bfloat16).astype(jnp.float32)
    wcomb32 = wcomb.astype(jnp.bfloat16).astype(jnp.float32)
    whh32 = whh.astype(jnp.bfloat16).astype(jnp.float32)
    h = jnp.zeros((bs, hidden), jnp.float32)
    c = jnp.zeros((bs, hidden), jnp.float32)
    for t in range(seq):
        xt = xf[:, t, :].astype(jnp.bfloat16).astype(jnp.float32)
        feat = hi(xt, wf32) + bf
        a = jnp.maximum(feat, 0.0).astype(jnp.bfloat16).astype(jnp.float32)
        gx = hi(a, wcomb32) + bcomb
        gates = gx + hi(h.astype(jnp.bfloat16).astype(jnp.float32), whh32)
        f_t = jax.nn.sigmoid(gates[:, 0 * hidden:1 * hidden])
        i_t = jax.nn.sigmoid(gates[:, 1 * hidden:2 * hidden])
        o_t = jax.nn.sigmoid(gates[:, 2 * hidden:3 * hidden])
        g_t = jnp.tanh(gates[:, 3 * hidden:4 * hidden])
        c = f_t * c + i_t * g_t
        h = o_t * jnp.tanh(c)
    return jnp.maximum(h, 0.0) @ wtail + btail


# --------------------------------- main ---------------------------------------
if __name__ == "__main__":
    # Shapes consistent with the module: rnn_input=32, rnn_hidden=32,
    # backbone feature dim = 512 (what cnn_lc's Linear(512, 32) expects).
    bs, seq = 2, 8
    C, D, H, W = 1, 4, 8, 8
    feat_in = C * D * H * W          # 256
    feat_out = 512                   # backbone output / cnn_lc input
    rnn_input = 32
    hidden = 32

    key = jax.random.PRNGKey(0)
    keys = jax.random.split(key, 8)

    x = jax.random.normal(keys[0], (bs, seq, C, D, H, W), jnp.float32)

    # Deterministic parameter init (shapes follow the module's __init__).
    wf = jax.random.normal(keys[1], (feat_in, feat_out), jnp.float32) * 0.05
    bf = jnp.zeros((1, feat_out), jnp.float32)
    wlc = jax.random.normal(keys[2], (feat_out, rnn_input), jnp.float32) * 0.05
    blc = jax.random.normal(keys[3], (1, rnn_input), jnp.float32) * 0.05
    wih = jax.random.normal(keys[4], (rnn_input, 4 * hidden), jnp.float32) * (
        (2.0 / rnn_input) ** 0.5)                          # ~kaiming_normal
    whh = jnp.linalg.qr(
        jax.random.normal(keys[5], (hidden, 4 * hidden), jnp.float32).T
    )[0].T.astype(jnp.float32)                             # ~orthogonal rows
    biav = jnp.zeros((1, 4 * hidden), jnp.float32)         # constant 0
    wtail = jax.random.normal(keys[6], (hidden, 1), jnp.float32) * 0.1
    btail = jax.random.normal(keys[7], (1, 1), jnp.float32) * 0.1

    params = (wf, bf, wlc, blc, wih, whh, biav, wtail, btail)

    out = maru_l0_cox_forward(x, params, hidden=hidden)
    out = jax.block_until_ready(out)

    ref = reference_forward(x, params, hidden)
    assert out.shape == (bs, 1)
    # bf16 MXU operands with f32 accumulation (reference mirrors the folding
    # and casts); tolerance covers accumulation-order differences only.
    assert jnp.allclose(out, ref, rtol=2e-3, atol=2e-3), (out, ref)

    print("KERNEL_OK")
</pallas_src>

<mosaic_0001>
module attributes {stable_mosaic.version = 11 : i64} {
  func.func @_gates_kernel(%arg0: i32, %arg1: memref<8x256xf32, #tpu.memory_space<vmem>>, %arg2: memref<256x512xbf16, #tpu.memory_space<vmem>>, %arg3: memref<1x512xf32, #tpu.memory_space<vmem>>, %arg4: memref<512x128xbf16, #tpu.memory_space<vmem>>, %arg5: memref<1x128xf32, #tpu.memory_space<vmem>>, %arg6: memref<8x128xf32, #tpu.memory_space<vmem>>) attributes {dimension_semantics = [#tpu.dimension_semantics<parallel>], iteration_bounds = array<i64: 2>, scalar_prefetch = 0 : i64, scratch_operands = 0 : i64, tpu.core_type = #tpu.core_type<tc>, window_params = [{transform_indices = @transform_0, window_bounds = array<i64: 8, 256>}, {pipeline_mode = #tpu.pipeline_mode<synchronous>, transform_indices = @transform_1, window_bounds = array<i64: 256, 512>}, {pipeline_mode = #tpu.pipeline_mode<synchronous>, transform_indices = @transform_2, window_bounds = array<i64: 1, 512>}, {pipeline_mode = #tpu.pipeline_mode<synchronous>, transform_indices = @transform_3, window_bounds = array<i64: 512, 128>}, {pipeline_mode = #tpu.pipeline_mode<synchronous>, transform_indices = @transform_4, window_bounds = array<i64: 1, 128>}, {transform_indices = @transform_5, window_bounds = array<i64: 8, 128>}]} {
    %c0 = arith.constant 0 : index
    %c0_0 = arith.constant 0 : index
    %0 = vector.load %arg1[%c0, %c0_0] : memref<8x256xf32, #tpu.memory_space<vmem>>, vector<8x256xf32>
    %1 = arith.truncf %0 : vector<8x256xf32> to vector<8x256xbf16>
    %c0_1 = arith.constant 0 : index
    %c0_2 = arith.constant 0 : index
    %2 = vector.load %arg2[%c0_1, %c0_2] : memref<256x512xbf16, #tpu.memory_space<vmem>>, vector<256x512xbf16>
    %cst = arith.constant dense<0.000000e+00> : vector<8x512xf32>
    %3 = tpu.matmul %1, %2, %cst {dimension_numbers = #tpu.dot_dimension_numbers<[1], [0], [0], [1], [0, 0, 1, 1], [], []>} : vector<8x256xbf16>, vector<256x512xbf16>, vector<8x512xf32> -> vector<8x512xf32>
    %c0_3 = arith.constant 0 : index
    %c0_4 = arith.constant 0 : index
    %4 = vector.load %arg3[%c0_3, %c0_4] : memref<1x512xf32, #tpu.memory_space<vmem>>, vector<1x512xf32>
    %5 = vector.broadcast %4 : vector<1x512xf32> to vector<8x512xf32>
    %6 = arith.addf %3, %5 : vector<8x512xf32>
    %cst_5 = arith.constant 0.000000e+00 : f32
    %7 = vector.broadcast %cst_5 : f32 to vector<8x512xf32>
    %8 = arith.maximumf %6, %7 : vector<8x512xf32>
    %9 = arith.truncf %8 : vector<8x512xf32> to vector<8x512xbf16>
    %c0_6 = arith.constant 0 : index
    %c0_7 = arith.constant 0 : index
    %10 = vector.load %arg4[%c0_6, %c0_7] : memref<512x128xbf16, #tpu.memory_space<vmem>>, vector<512x128xbf16>
    %cst_8 = arith.constant dense<0.000000e+00> : vector<8x128xf32>
    %11 = tpu.matmul %9, %10, %cst_8 {dimension_numbers = #tpu.dot_dimension_numbers<[1], [0], [0], [1], [0, 0, 1, 1], [], []>} : vector<8x512xbf16>, vector<512x128xbf16>, vector<8x128xf32> -> vector<8x128xf32>
    %c0_9 = arith.constant 0 : index
    %c0_10 = arith.constant 0 : index
    %12 = vector.load %arg5[%c0_9, %c0_10] : memref<1x128xf32, #tpu.memory_space<vmem>>, vector<1x128xf32>
    %13 = vector.broadcast %12 : vector<1x128xf32> to vector<8x128xf32>
    %14 = arith.addf %11, %13 : vector<8x128xf32>
    %c0_11 = arith.constant 0 : index
    %c0_12 = arith.constant 0 : index
    %15 = vector.load %arg6[%c0_11, %c0_12] : memref<8x128xf32, #tpu.memory_space<vmem>>, vector<8x128xf32>
    tpu.vector_store %arg6[%c0_11, %c0_12], %14 {strides = array<i32>} : memref<8x128xf32, #tpu.memory_space<vmem>>, vector<8x128xf32>,
    return
  }
  func.func @transform_0(%arg0: i32) -> (i32, i32) {
    %c0_i32 = arith.constant 0 : i32
    %c0_i32_0 = arith.constant 0 : i32
    return %arg0, %c0_i32 : i32, i32
  }
  func.func @transform_1(%arg0: i32) -> (i32, i32) {
    %c0_i32 = arith.constant 0 : i32
    %c0_i32_0 = arith.constant 0 : i32
    %c0_i32_1 = arith.constant 0 : i32
    return %c0_i32, %c0_i32_0 : i32, i32
  }
  func.func @transform_2(%arg0: i32) -> (i32, i32) {
    %c0_i32 = arith.constant 0 : i32
    %c0_i32_0 = arith.constant 0 : i32
    %c0_i32_1 = arith.constant 0 : i32
    return %c0_i32, %c0_i32_0 : i32, i32
  }
  func.func @transform_3(%arg0: i32) -> (i32, i32) {
    %c0_i32 = arith.constant 0 : i32
    %c0_i32_0 = arith.constant 0 : i32
    %c0_i32_1 = arith.constant 0 : i32
    return %c0_i32, %c0_i32_0 : i32, i32
  }
  func.func @transform_4(%arg0: i32) -> (i32, i32) {
    %c0_i32 = arith.constant 0 : i32
    %c0_i32_0 = arith.constant 0 : i32
    %c0_i32_1 = arith.constant 0 : i32
    return %c0_i32, %c0_i32_0 : i32, i32
  }
  func.func @transform_5(%arg0: i32) -> (i32, i32) {
    %c0_i32 = arith.constant 0 : i32
    %c0_i32_0 = arith.constant 0 : i32
    return %arg0, %c0_i32 : i32, i32
  }
}

module attributes {stable_mosaic.version = 11 : i64} {
  func.func @_recurrent_kernel(%arg0: i32, %arg1: memref<8x2x128xf32, #tpu.memory_space<vmem>>, %arg2: memref<32x128xbf16, #tpu.memory_space<vmem>>, %arg3: memref<1x32xf32, #tpu.memory_space<vmem>>, %arg4: memref<1x1xf32, #tpu.memory_space<vmem>>, %arg5: memref<2x1xf32, #tpu.memory_space<vmem>>, %arg6: memref<2x32xf32, #tpu.memory_space<vmem>>, %arg7: memref<2x32xf32, #tpu.memory_space<vmem>>) attributes {dimension_semantics = [#tpu.dimension_semantics<arbitrary>], iteration_bounds = array<i64: 1>, scalar_prefetch = 0 : i64, scratch_operands = 2 : i64, tpu.core_type = #tpu.core_type<tc>, window_params = [{transform_indices = @transform_0, window_bounds = array<i64: 8, 2, 128>}, {pipeline_mode = #tpu.pipeline_mode<synchronous>, transform_indices = @transform_1, window_bounds = array<i64: 32, 128>}, {pipeline_mode = #tpu.pipeline_mode<synchronous>, transform_indices = @transform_2, window_bounds = array<i64: 1, 32>}, {pipeline_mode = #tpu.pipeline_mode<synchronous>, transform_indices = @transform_3, window_bounds = array<i64: 1, 1>}, {pipeline_mode = #tpu.pipeline_mode<synchronous>, transform_indices = @transform_4, window_bounds = array<i64: 2, 1>}]} {
    %c0_i32 = arith.constant 0 : i32
    %0 = arith.cmpi eq, %arg0, %c0_i32 : i32
    %1 = arith.extui %0 : i1 to i32
    %c0_i32_0 = arith.constant 0 : i32
    %2 = arith.cmpi ne, %1, %c0_i32_0 : i32
    scf.if %2 {
      %cst_114 = arith.constant 0.000000e+00 : f32
      %222 = vector.broadcast %cst_114 : f32 to vector<2x32xf32>
      %c0_115 = arith.constant 0 : index
      %c0_116 = arith.constant 0 : index
      %223 = vector.load %arg6[%c0_115, %c0_116] : memref<2x32xf32, #tpu.memory_space<vmem>>, vector<2x32xf32>
      tpu.vector_store %arg6[%c0_115, %c0_116], %222 {strides = array<i32>} : memref<2x32xf32, #tpu.memory_space<vmem>>, vector<2x32xf32>,
      %cst_117 = arith.constant 0.000000e+00 : f32
      %224 = vector.broadcast %cst_117 : f32 to vector<2x32xf32>
      %c0_118 = arith.constant 0 : index
      %c0_119 = arith.constant 0 : index
      %225 = vector.load %arg7[%c0_118, %c0_119] : memref<2x32xf32, #tpu.memory_space<vmem>>, vector<2x32xf32>
      tpu.vector_store %arg7[%c0_118, %c0_119], %224 {strides = array<i32>} : memref<2x32xf32, #tpu.memory_space<vmem>>, vector<2x32xf32>,
    } else {
    }
    %c0_i32_1 = arith.constant 0 : i32
    %3 = arith.index_cast %c0_i32_1 : i32 to index
    %c0 = arith.constant 0 : index
    %c0_2 = arith.constant 0 : index
    %4 = vector.load %arg1[%3, %c0, %c0_2] : memref<8x2x128xf32, #tpu.memory_space<vmem>>, vector<1x2x128xf32>
    %5 = vector.shape_cast %4 : vector<1x2x128xf32> to vector<2x128xf32>
    %c0_3 = arith.constant 0 : index
    %c0_4 = arith.constant 0 : index
    %6 = vector.load %arg6[%c0_3, %c0_4] : memref<2x32xf32, #tpu.memory_space<vmem>>, vector<2x32xf32>
    %7 = arith.truncf %6 : vector<2x32xf32> to vector<2x32xbf16>
    %c0_5 = arith.constant 0 : index
    %c0_6 = arith.constant 0 : index
    %8 = vector.load %arg2[%c0_5, %c0_6] : memref<32x128xbf16, #tpu.memory_space<vmem>>, vector<32x128xbf16>
    %cst = arith.constant dense<0.000000e+00> : vector<2x128xf32>
    %9 = tpu.matmul %7, %8, %cst {dimension_numbers = #tpu.dot_dimension_numbers<[1], [0], [0], [1], [0, 0, 1, 1], [], []>} : vector<2x32xbf16>, vector<32x128xbf16>, vector<2x128xf32> -> vector<2x128xf32>
    %10 = arith.addf %5, %9 : vector<2x128xf32>
    %11 = vector.extract_strided_slice %10 {offsets = [0, 0], sizes = [2, 96], strides = [1, 1]} : vector<2x128xf32> to vector<2x96xf32>
    %12 = arith.negf %11 : vector<2x96xf32>
    %13 = math.exp %12 : vector<2x96xf32>
    %cst_7 = arith.constant 1.000000e+00 : f32
    %14 = vector.broadcast %cst_7 : f32 to vector<2x96xf32>
    %15 = arith.addf %14, %13 : vector<2x96xf32>
    %16 = arith.divf %14, %15 : vector<2x96xf32>
    %17 = vector.extract_strided_slice %10 {offsets = [0, 96], sizes = [2, 32], strides = [1, 1]} : vector<2x128xf32> to vector<2x32xf32>
    %18 = math.tanh %17 : vector<2x32xf32>
    %19 = vector.extract_strided_slice %16 {offsets = [0, 0], sizes = [2, 32], strides = [1, 1]} : vector<2x96xf32> to vector<2x32xf32>
    %20 = vector.extract_strided_slice %16 {offsets = [0, 32], sizes = [2, 32], strides = [1, 1]} : vector<2x96xf32> to vector<2x32xf32>
    %21 = vector.extract_strided_slice %16 {offsets = [0, 64], sizes = [2, 32], strides = [1, 1]} : vector<2x96xf32> to vector<2x32xf32>
    %c0_8 = arith.constant 0 : index
    %c0_9 = arith.constant 0 : index
    %22 = vector.load %arg7[%c0_8, %c0_9] : memref<2x32xf32, #tpu.memory_space<vmem>>, vector<2x32xf32>
    %23 = arith.mulf %19, %22 : vector<2x32xf32>
    %24 = arith.mulf %20, %18 : vector<2x32xf32>
    %25 = arith.addf %23, %24 : vector<2x32xf32>
    %26 = math.tanh %25 : vector<2x32xf32>
    %27 = arith.mulf %21, %26 : vector<2x32xf32>
    %c0_10 = arith.constant 0 : index
    %c0_11 = arith.constant 0 : index
    %28 = vector.load %arg7[%c0_10, %c0_11] : memref<2x32xf32, #tpu.memory_space<vmem>>, vector<2x32xf32>
    tpu.vector_store %arg7[%c0_10, %c0_11], %25 {strides = array<i32>} : memref<2x32xf32, #tpu.memory_space<vmem>>, vector<2x32xf32>,
    %c0_12 = arith.constant 0 : index
    %c0_13 = arith.constant 0 : index
    %29 = vector.load %arg6[%c0_12, %c0_13] : memref<2x32xf32, #tpu.memory_space<vmem>>, vector<2x32xf32>
    tpu.vector_store %arg6[%c0_12, %c0_13], %27 {strides = array<i32>} : memref<2x32xf32, #tpu.memory_space<vmem>>, vector<2x32xf32>,
    %c1_i32 = arith.constant 1 : i32
    %30 = arith.index_cast %c1_i32 : i32 to index
    %c0_14 = arith.constant 0 : index
    %c0_15 = arith.constant 0 : index
    %31 = vector.load %arg1[%30, %c0_14, %c0_15] : memref<8x2x128xf32, #tpu.memory_space<vmem>>, vector<1x2x128xf32>
    %32 = vector.shape_cast %31 : vector<1x2x128xf32> to vector<2x128xf32>
    %c0_16 = arith.constant 0 : index
    %c0_17 = arith.constant 0 : index
    %33 = vector.load %arg6[%c0_16, %c0_17] : memref<2x32xf32, #tpu.memory_space<vmem>>, vector<2x32xf32>
    %34 = arith.truncf %33 : vector<2x32xf32> to vector<2x32xbf16>
    %c0_18 = arith.constant 0 : index
    %c0_19 = arith.constant 0 : index
    %35 = vector.load %arg2[%c0_18, %c0_19] : memref<32x128xbf16, #tpu.memory_space<vmem>>, vector<32x128xbf16>
    %cst_20 = arith.constant dense<0.000000e+00> : vector<2x128xf32>
    %36 = tpu.matmul %34, %35, %cst_20 {dimension_numbers = #tpu.dot_dimension_numbers<[1], [0], [0], [1], [0, 0, 1, 1], [], []>} : vector<2x32xbf16>, vector<32x128xbf16>, vector<2x128xf32> -> vector<2x128xf32>
    %37 = arith.addf %32, %36 : vector<2x128xf32>
    %38 = vector.extract_strided_slice %37 {offsets = [0, 0], sizes = [2, 96], strides = [1, 1]} : vector<2x128xf32> to vector<2x96xf32>
    %39 = arith.negf %38 : vector<2x96xf32>
    %40 = math.exp %39 : vector<2x96xf32>
    %cst_21 = arith.constant 1.000000e+00 : f32
    %41 = vector.broadcast %cst_21 : f32 to vector<2x96xf32>
    %42 = arith.addf %41, %40 : vector<2x96xf32>
    %43 = arith.divf %41, %42 : vector<2x96xf32>
    %44 = vector.extract_strided_slice %37 {offsets = [0, 96], sizes = [2, 32], strides = [1, 1]} : vector<2x128xf32> to vector<2x32xf32>
    %45 = math.tanh %44 : vector<2x32xf32>
    %46 = vector.extract_strided_slice %43 {offsets = [0, 0], sizes = [2, 32], strides = [1, 1]} : vector<2x96xf32> to vector<2x32xf32>
    %47 = vector.extract_strided_slice %43 {offsets = [0, 32], sizes = [2, 32], strides = [1, 1]} : vector<2x96xf32> to vector<2x32xf32>
    %48 = vector.extract_strided_slice %43 {offsets = [0, 64], sizes = [2, 32], strides = [1, 1]} : vector<2x96xf32> to vector<2x32xf32>
    %c0_22 = arith.constant 0 : index
    %c0_23 = arith.constant 0 : index
    %49 = vector.load %arg7[%c0_22, %c0_23] : memref<2x32xf32, #tpu.memory_space<vmem>>, vector<2x32xf32>
    %50 = arith.mulf %46, %49 : vector<2x32xf32>
    %51 = arith.mulf %47, %45 : vector<2x32xf32>
    %52 = arith.addf %50, %51 : vector<2x32xf32>
    %53 = math.tanh %52 : vector<2x32xf32>
    %54 = arith.mulf %48, %53 : vector<2x32xf32>
    %c0_24 = arith.constant 0 : index
    %c0_25 = arith.constant 0 : index
    %55 = vector.load %arg7[%c0_24, %c0_25] : memref<2x32xf32, #tpu.memory_space<vmem>>, vector<2x32xf32>
    tpu.vector_store %arg7[%c0_24, %c0_25], %52 {strides = array<i32>} : memref<2x32xf32, #tpu.memory_space<vmem>>, vector<2x32xf32>,
    %c0_26 = arith.constant 0 : index
    %c0_27 = arith.constant 0 : index
    %56 = vector.load %arg6[%c0_26, %c0_27] : memref<2x32xf32, #tpu.memory_space<vmem>>, vector<2x32xf32>
    tpu.vector_store %arg6[%c0_26, %c0_27], %54 {strides = array<i32>} : memref<2x32xf32, #tpu.memory_space<vmem>>, vector<2x32xf32>,
    %c2_i32 = arith.constant 2 : i32
    %57 = arith.index_cast %c2_i32 : i32 to index
    %c0_28 = arith.constant 0 : index
    %c0_29 = arith.constant 0 : index
    %58 = vector.load %arg1[%57, %c0_28, %c0_29] : memref<8x2x128xf32, #tpu.memory_space<vmem>>, vector<1x2x128xf32>
    %59 = vector.shape_cast %58 : vector<1x2x128xf32> to vector<2x128xf32>
    %c0_30 = arith.constant 0 : index
    %c0_31 = arith.constant 0 : index
    %60 = vector.load %arg6[%c0_30, %c0_31] : memref<2x32xf32, #tpu.memory_space<vmem>>, vector<2x32xf32>
    %61 = arith.truncf %60 : vector<2x32xf32> to vector<2x32xbf16>
    %c0_32 = arith.constant 0 : index
    %c0_33 = arith.constant 0 : index
    %62 = vector.load %arg2[%c0_32, %c0_33] : memref<32x128xbf16, #tpu.memory_space<vmem>>, vector<32x128xbf16>
    %cst_34 = arith.constant dense<0.000000e+00> : vector<2x128xf32>
    %63 = tpu.matmul %61, %62, %cst_34 {dimension_numbers = #tpu.dot_dimension_numbers<[1], [0], [0], [1], [0, 0, 1, 1], [], []>} : vector<2x32xbf16>, vector<32x128xbf16>, vector<2x128xf32> -> vector<2x128xf32>
    %64 = arith.addf %59, %63 : vector<2x128xf32>
    %65 = vector.extract_strided_slice %64 {offsets = [0, 0], sizes = [2, 96], strides = [1, 1]} : vector<2x128xf32> to vector<2x96xf32>
    %66 = arith.negf %65 : vector<2x96xf32>
    %67 = math.exp %66 : vector<2x96xf32>
    %cst_35 = arith.constant 1.000000e+00 : f32
    %68 = vector.broadcast %cst_35 : f32 to vector<2x96xf32>
    %69 = arith.addf %68, %67 : vector<2x96xf32>
    %70 = arith.divf %68, %69 : vector<2x96xf32>
    %71 = vector.extract_strided_slice %64 {offsets = [0, 96], sizes = [2, 32], strides = [1, 1]} : vector<2x128xf32> to vector<2x32xf32>
    %72 = math.tanh %71 : vector<2x32xf32>
    %73 = vector.extract_strided_slice %70 {offsets = [0, 0], sizes = [2, 32], strides = [1, 1]} : vector<2x96xf32> to vector<2x32xf32>
    %74 = vector.extract_strided_slice %70 {offsets = [0, 32], sizes = [2, 32], strides = [1, 1]} : vector<2x96xf32> to vector<2x32xf32>
    %75 = vector.extract_strided_slice %70 {offsets = [0, 64], sizes = [2, 32], strides = [1, 1]} : vector<2x96xf32> to vector<2x32xf32>
    %c0_36 = arith.constant 0 : index
    %c0_37 = arith.constant 0 : index
    %76 = vector.load %arg7[%c0_36, %c0_37] : memref<2x32xf32, #tpu.memory_space<vmem>>, vector<2x32xf32>
    %77 = arith.mulf %73, %76 : vector<2x32xf32>
    %78 = arith.mulf %74, %72 : vector<2x32xf32>
    %79 = arith.addf %77, %78 : vector<2x32xf32>
    %80 = math.tanh %79 : vector<2x32xf32>
    %81 = arith.mulf %75, %80 : vector<2x32xf32>
    %c0_38 = arith.constant 0 : index
    %c0_39 = arith.constant 0 : index
    %82 = vector.load %arg7[%c0_38, %c0_39] : memref<2x32xf32, #tpu.memory_space<vmem>>, vector<2x32xf32>
    tpu.vector_store %arg7[%c0_38, %c0_39], %79 {strides = array<i32>} : memref<2x32xf32, #tpu.memory_space<vmem>>, vector<2x32xf32>,
    %c0_40 = arith.constant 0 : index
    %c0_41 = arith.constant 0 : index
    %83 = vector.load %arg6[%c0_40, %c0_41] : memref<2x32xf32, #tpu.memory_space<vmem>>, vector<2x32xf32>
    tpu.vector_store %arg6[%c0_40, %c0_41], %81 {strides = array<i32>} : memref<2x32xf32, #tpu.memory_space<vmem>>, vector<2x32xf32>,
    %c3_i32 = arith.constant 3 : i32
    %84 = arith.index_cast %c3_i32 : i32 to index
    %c0_42 = arith.constant 0 : index
    %c0_43 = arith.constant 0 : index
    %85 = vector.load %arg1[%84, %c0_42, %c0_43] : memref<8x2x128xf32, #tpu.memory_space<vmem>>, vector<1x2x128xf32>
    %86 = vector.shape_cast %85 : vector<1x2x128xf32> to vector<2x128xf32>
    %c0_44 = arith.constant 0 : index
    %c0_45 = arith.constant 0 : index
    %87 = vector.load %arg6[%c0_44, %c0_45] : memref<2x32xf32, #tpu.memory_space<vmem>>, vector<2x32xf32>
    %88 = arith.truncf %87 : vector<2x32xf32> to vector<2x32xbf16>
    %c0_46 = arith.constant 0 : index
    %c0_47 = arith.constant 0 : index
    %89 = vector.load %arg2[%c0_46, %c0_47] : memref<32x128xbf16, #tpu.memory_space<vmem>>, vector<32x128xbf16>
    %cst_48 = arith.constant dense<0.000000e+00> : vector<2x128xf32>
    %90 = tpu.matmul %88, %89, %cst_48 {dimension_numbers = #tpu.dot_dimension_numbers<[1], [0], [0], [1], [0, 0, 1, 1], [], []>} : vector<2x32xbf16>, vector<32x128xbf16>, vector<2x128xf32> -> vector<2x128xf32>
    %91 = arith.addf %86, %90 : vector<2x128xf32>
    %92 = vector.extract_strided_slice %91 {offsets = [0, 0], sizes = [2, 96], strides = [1, 1]} : vector<2x128xf32> to vector<2x96xf32>
    %93 = arith.negf %92 : vector<2x96xf32>
    %94 = math.exp %93 : vector<2x96xf32>
    %cst_49 = arith.constant 1.000000e+00 : f32
    %95 = vector.broadcast %cst_49 : f32 to vector<2x96xf32>
    %96 = arith.addf %95, %94 : vector<2x96xf32>
    %97 = arith.divf %95, %96 : vector<2x96xf32>
    %98 = vector.extract_strided_slice %91 {offsets = [0, 96], sizes = [2, 32], strides = [1, 1]} : vector<2x128xf32> to vector<2x32xf32>
    %99 = math.tanh %98 : vector<2x32xf32>
    %100 = vector.extract_strided_slice %97 {offsets = [0, 0], sizes = [2, 32], strides = [1, 1]} : vector<2x96xf32> to vector<2x32xf32>
    %101 = vector.extract_strided_slice %97 {offsets = [0, 32], sizes = [2, 32], strides = [1, 1]} : vector<2x96xf32> to vector<2x32xf32>
    %102 = vector.extract_strided_slice %97 {offsets = [0, 64], sizes = [2, 32], strides = [1, 1]} : vector<2x96xf32> to vector<2x32xf32>
    %c0_50 = arith.constant 0 : index
    %c0_51 = arith.constant 0 : index
    %103 = vector.load %arg7[%c0_50, %c0_51] : memref<2x32xf32, #tpu.memory_space<vmem>>, vector<2x32xf32>
    %104 = arith.mulf %100, %103 : vector<2x32xf32>
    %105 = arith.mulf %101, %99 : vector<2x32xf32>
    %106 = arith.addf %104, %105 : vector<2x32xf32>
    %107 = math.tanh %106 : vector<2x32xf32>
    %108 = arith.mulf %102, %107 : vector<2x32xf32>
    %c0_52 = arith.constant 0 : index
    %c0_53 = arith.constant 0 : index
    %109 = vector.load %arg7[%c0_52, %c0_53] : memref<2x32xf32, #tpu.memory_space<vmem>>, vector<2x32xf32>
    tpu.vector_store %arg7[%c0_52, %c0_53], %106 {strides = array<i32>} : memref<2x32xf32, #tpu.memory_space<vmem>>, vector<2x32xf32>,
    %c0_54 = arith.constant 0 : index
    %c0_55 = arith.constant 0 : index
    %110 = vector.load %arg6[%c0_54, %c0_55] : memref<2x32xf32, #tpu.memory_space<vmem>>, vector<2x32xf32>
    tpu.vector_store %arg6[%c0_54, %c0_55], %108 {strides = array<i32>} : memref<2x32xf32, #tpu.memory_space<vmem>>, vector<2x32xf32>,
    %c4_i32 = arith.constant 4 : i32
    %111 = arith.index_cast %c4_i32 : i32 to index
    %c0_56 = arith.constant 0 : index
    %c0_57 = arith.constant 0 : index
    %112 = vector.load %arg1[%111, %c0_56, %c0_57] : memref<8x2x128xf32, #tpu.memory_space<vmem>>, vector<1x2x128xf32>
    %113 = vector.shape_cast %112 : vector<1x2x128xf32> to vector<2x128xf32>
    %c0_58 = arith.constant 0 : index
    %c0_59 = arith.constant 0 : index
    %114 = vector.load %arg6[%c0_58, %c0_59] : memref<2x32xf32, #tpu.memory_space<vmem>>, vector<2x32xf32>
    %115 = arith.truncf %114 : vector<2x32xf32> to vector<2x32xbf16>
    %c0_60 = arith.constant 0 : index
    %c0_61 = arith.constant 0 : index
    %116 = vector.load %arg2[%c0_60, %c0_61] : memref<32x128xbf16, #tpu.memory_space<vmem>>, vector<32x128xbf16>
    %cst_62 = arith.constant dense<0.000000e+00> : vector<2x128xf32>
    %117 = tpu.matmul %115, %116, %cst_62 {dimension_numbers = #tpu.dot_dimension_numbers<[1], [0], [0], [1], [0, 0, 1, 1], [], []>} : vector<2x32xbf16>, vector<32x128xbf16>, vector<2x128xf32> -> vector<2x128xf32>
    %118 = arith.addf %113, %117 : vector<2x128xf32>
    %119 = vector.extract_strided_slice %118 {offsets = [0, 0], sizes = [2, 96], strides = [1, 1]} : vector<2x128xf32> to vector<2x96xf32>
    %120 = arith.negf %119 : vector<2x96xf32>
    %121 = math.exp %120 : vector<2x96xf32>
    %cst_63 = arith.constant 1.000000e+00 : f32
    %122 = vector.broadcast %cst_63 : f32 to vector<2x96xf32>
    %123 = arith.addf %122, %121 : vector<2x96xf32>
    %124 = arith.divf %122, %123 : vector<2x96xf32>
    %125 = vector.extract_strided_slice %118 {offsets = [0, 96], sizes = [2, 32], strides = [1, 1]} : vector<2x128xf32> to vector<2x32xf32>
    %126 = math.tanh %125 : vector<2x32xf32>
    %127 = vector.extract_strided_slice %124 {offsets = [0, 0], sizes = [2, 32], strides = [1, 1]} : vector<2x96xf32> to vector<2x32xf32>
    %128 = vector.extract_strided_slice %124 {offsets = [0, 32], sizes = [2, 32], strides = [1, 1]} : vector<2x96xf32> to vector<2x32xf32>
    %129 = vector.extract_strided_slice %124 {offsets = [0, 64], sizes = [2, 32], strides = [1, 1]} : vector<2x96xf32> to vector<2x32xf32>
    %c0_64 = arith.constant 0 : index
    %c0_65 = arith.constant 0 : index
    %130 = vector.load %arg7[%c0_64, %c0_65] : memref<2x32xf32, #tpu.memory_space<vmem>>, vector<2x32xf32>
    %131 = arith.mulf %127, %130 : vector<2x32xf32>
    %132 = arith.mulf %128, %126 : vector<2x32xf32>
    %133 = arith.addf %131, %132 : vector<2x32xf32>
    %134 = math.tanh %133 : vector<2x32xf32>
    %135 = arith.mulf %129, %134 : vector<2x32xf32>
    %c0_66 = arith.constant 0 : index
    %c0_67 = arith.constant 0 : index
    %136 = vector.load %arg7[%c0_66, %c0_67] : memref<2x32xf32, #tpu.memory_space<vmem>>, vector<2x32xf32>
    tpu.vector_store %arg7[%c0_66, %c0_67], %133 {strides = array<i32>} : memref<2x32xf32, #tpu.memory_space<vmem>>, vector<2x32xf32>,
    %c0_68 = arith.constant 0 : index
    %c0_69 = arith.constant 0 : index
    %137 = vector.load %arg6[%c0_68, %c0_69] : memref<2x32xf32, #tpu.memory_space<vmem>>, vector<2x32xf32>
    tpu.vector_store %arg6[%c0_68, %c0_69], %135 {strides = array<i32>} : memref<2x32xf32, #tpu.memory_space<vmem>>, vector<2x32xf32>,
    %c5_i32 = arith.constant 5 : i32
    %138 = arith.index_cast %c5_i32 : i32 to index
    %c0_70 = arith.constant 0 : index
    %c0_71 = arith.constant 0 : index
    %139 = vector.load %arg1[%138, %c0_70, %c0_71] : memref<8x2x128xf32, #tpu.memory_space<vmem>>, vector<1x2x128xf32>
    %140 = vector.shape_cast %139 : vector<1x2x128xf32> to vector<2x128xf32>
    %c0_72 = arith.constant 0 : index
    %c0_73 = arith.constant 0 : index
    %141 = vector.load %arg6[%c0_72, %c0_73] : memref<2x32xf32, #tpu.memory_space<vmem>>, vector<2x32xf32>
    %142 = arith.truncf %141 : vector<2x32xf32> to vector<2x32xbf16>
    %c0_74 = arith.constant 0 : index
    %c0_75 = arith.constant 0 : index
    %143 = vector.load %arg2[%c0_74, %c0_75] : memref<32x128xbf16, #tpu.memory_space<vmem>>, vector<32x128xbf16>
    %cst_76 = arith.constant dense<0.000000e+00> : vector<2x128xf32>
    %144 = tpu.matmul %142, %143, %cst_76 {dimension_numbers = #tpu.dot_dimension_numbers<[1], [0], [0], [1], [0, 0, 1, 1], [], []>} : vector<2x32xbf16>, vector<32x128xbf16>, vector<2x128xf32> -> vector<2x128xf32>
    %145 = arith.addf %140, %144 : vector<2x128xf32>
    %146 = vector.extract_strided_slice %145 {offsets = [0, 0], sizes = [2, 96], strides = [1, 1]} : vector<2x128xf32> to vector<2x96xf32>
    %147 = arith.negf %146 : vector<2x96xf32>
    %148 = math.exp %147 : vector<2x96xf32>
    %cst_77 = arith.constant 1.000000e+00 : f32
    %149 = vector.broadcast %cst_77 : f32 to vector<2x96xf32>
    %150 = arith.addf %149, %148 : vector<2x96xf32>
    %151 = arith.divf %149, %150 : vector<2x96xf32>
    %152 = vector.extract_strided_slice %145 {offsets = [0, 96], sizes = [2, 32], strides = [1, 1]} : vector<2x128xf32> to vector<2x32xf32>
    %153 = math.tanh %152 : vector<2x32xf32>
    %154 = vector.extract_strided_slice %151 {offsets = [0, 0], sizes = [2, 32], strides = [1, 1]} : vector<2x96xf32> to vector<2x32xf32>
    %155 = vector.extract_strided_slice %151 {offsets = [0, 32], sizes = [2, 32], strides = [1, 1]} : vector<2x96xf32> to vector<2x32xf32>
    %156 = vector.extract_strided_slice %151 {offsets = [0, 64], sizes = [2, 32], strides = [1, 1]} : vector<2x96xf32> to vector<2x32xf32>
    %c0_78 = arith.constant 0 : index
    %c0_79 = arith.constant 0 : index
    %157 = vector.load %arg7[%c0_78, %c0_79] : memref<2x32xf32, #tpu.memory_space<vmem>>, vector<2x32xf32>
    %158 = arith.mulf %154, %157 : vector<2x32xf32>
    %159 = arith.mulf %155, %153 : vector<2x32xf32>
    %160 = arith.addf %158, %159 : vector<2x32xf32>
    %161 = math.tanh %160 : vector<2x32xf32>
    %162 = arith.mulf %156, %161 : vector<2x32xf32>
    %c0_80 = arith.constant 0 : index
    %c0_81 = arith.constant 0 : index
    %163 = vector.load %arg7[%c0_80, %c0_81] : memref<2x32xf32, #tpu.memory_space<vmem>>, vector<2x32xf32>
    tpu.vector_store %arg7[%c0_80, %c0_81], %160 {strides = array<i32>} : memref<2x32xf32, #tpu.memory_space<vmem>>, vector<2x32xf32>,
    %c0_82 = arith.constant 0 : index
    %c0_83 = arith.constant 0 : index
    %164 = vector.load %arg6[%c0_82, %c0_83] : memref<2x32xf32, #tpu.memory_space<vmem>>, vector<2x32xf32>
    tpu.vector_store %arg6[%c0_82, %c0_83], %162 {strides = array<i32>} : memref<2x32xf32, #tpu.memory_space<vmem>>, vector<2x32xf32>,
    %c6_i32 = arith.constant 6 : i32
    %165 = arith.index_cast %c6_i32 : i32 to index
    %c0_84 = arith.constant 0 : index
    %c0_85 = arith.constant 0 : index
    %166 = vector.load %arg1[%165, %c0_84, %c0_85] : memref<8x2x128xf32, #tpu.memory_space<vmem>>, vector<1x2x128xf32>
    %167 = vector.shape_cast %166 : vector<1x2x128xf32> to vector<2x128xf32>
    %c0_86 = arith.constant 0 : index
    %c0_87 = arith.constant 0 : index
    %168 = vector.load %arg6[%c0_86, %c0_87] : memref<2x32xf32, #tpu.memory_space<vmem>>, vector<2x32xf32>
    %169 = arith.truncf %168 : vector<2x32xf32> to vector<2x32xbf16>
    %c0_88 = arith.constant 0 : index
    %c0_89 = arith.constant 0 : index
    %170 = vector.load %arg2[%c0_88, %c0_89] : memref<32x128xbf16, #tpu.memory_space<vmem>>, vector<32x128xbf16>
    %cst_90 = arith.constant dense<0.000000e+00> : vector<2x128xf32>
    %171 = tpu.matmul %169, %170, %cst_90 {dimension_numbers = #tpu.dot_dimension_numbers<[1], [0], [0], [1], [0, 0, 1, 1], [], []>} : vector<2x32xbf16>, vector<32x128xbf16>, vector<2x128xf32> -> vector<2x128xf32>
    %172 = arith.addf %167, %171 : vector<2x128xf32>
    %173 = vector.extract_strided_slice %172 {offsets = [0, 0], sizes = [2, 96], strides = [1, 1]} : vector<2x128xf32> to vector<2x96xf32>
    %174 = arith.negf %173 : vector<2x96xf32>
    %175 = math.exp %174 : vector<2x96xf32>
    %cst_91 = arith.constant 1.000000e+00 : f32
    %176 = vector.broadcast %cst_91 : f32 to vector<2x96xf32>
    %177 = arith.addf %176, %175 : vector<2x96xf32>
    %178 = arith.divf %176, %177 : vector<2x96xf32>
    %179 = vector.extract_strided_slice %172 {offsets = [0, 96], sizes = [2, 32], strides = [1, 1]} : vector<2x128xf32> to vector<2x32xf32>
    %180 = math.tanh %179 : vector<2x32xf32>
    %181 = vector.extract_strided_slice %178 {offsets = [0, 0], sizes = [2, 32], strides = [1, 1]} : vector<2x96xf32> to vector<2x32xf32>
    %182 = vector.extract_strided_slice %178 {offsets = [0, 32], sizes = [2, 32], strides = [1, 1]} : vector<2x96xf32> to vector<2x32xf32>
    %183 = vector.extract_strided_slice %178 {offsets = [0, 64], sizes = [2, 32], strides = [1, 1]} : vector<2x96xf32> to vector<2x32xf32>
    %c0_92 = arith.constant 0 : index
    %c0_93 = arith.constant 0 : index
    %184 = vector.load %arg7[%c0_92, %c0_93] : memref<2x32xf32, #tpu.memory_space<vmem>>, vector<2x32xf32>
    %185 = arith.mulf %181, %184 : vector<2x32xf32>
    %186 = arith.mulf %182, %180 : vector<2x32xf32>
    %187 = arith.addf %185, %186 : vector<2x32xf32>
    %188 = math.tanh %187 : vector<2x32xf32>
    %189 = arith.mulf %183, %188 : vector<2x32xf32>
    %c0_94 = arith.constant 0 : index
    %c0_95 = arith.constant 0 : index
    %190 = vector.load %arg7[%c0_94, %c0_95] : memref<2x32xf32, #tpu.memory_space<vmem>>, vector<2x32xf32>
    tpu.vector_store %arg7[%c0_94, %c0_95], %187 {strides = array<i32>} : memref<2x32xf32, #tpu.memory_space<vmem>>, vector<2x32xf32>,
    %c0_96 = arith.constant 0 : index
    %c0_97 = arith.constant 0 : index
    %191 = vector.load %arg6[%c0_96, %c0_97] : memref<2x32xf32, #tpu.memory_space<vmem>>, vector<2x32xf32>
    tpu.vector_store %arg6[%c0_96, %c0_97], %189 {strides = array<i32>} : memref<2x32xf32, #tpu.memory_space<vmem>>, vector<2x32xf32>,
    %c7_i32 = arith.constant 7 : i32
    %192 = arith.index_cast %c7_i32 : i32 to index
    %c0_98 = arith.constant 0 : index
    %c0_99 = arith.constant 0 : index
    %193 = vector.load %arg1[%192, %c0_98, %c0_99] : memref<8x2x128xf32, #tpu.memory_space<vmem>>, vector<1x2x128xf32>
    %194 = vector.shape_cast %193 : vector<1x2x128xf32> to vector<2x128xf32>
    %c0_100 = arith.constant 0 : index
    %c0_101 = arith.constant 0 : index
    %195 = vector.load %arg6[%c0_100, %c0_101] : memref<2x32xf32, #tpu.memory_space<vmem>>, vector<2x32xf32>
    %196 = arith.truncf %195 : vector<2x32xf32> to vector<2x32xbf16>
    %c0_102 = arith.constant 0 : index
    %c0_103 = arith.constant 0 : index
    %197 = vector.load %arg2[%c0_102, %c0_103] : memref<32x128xbf16, #tpu.memory_space<vmem>>, vector<32x128xbf16>
    %cst_104 = arith.constant dense<0.000000e+00> : vector<2x128xf32>
    %198 = tpu.matmul %196, %197, %cst_104 {dimension_numbers = #tpu.dot_dimension_numbers<[1], [0], [0], [1], [0, 0, 1, 1], [], []>} : vector<2x32xbf16>, vector<32x128xbf16>, vector<2x128xf32> -> vector<2x128xf32>
    %199 = arith.addf %194, %198 : vector<2x128xf32>
    %200 = vector.extract_strided_slice %199 {offsets = [0, 0], sizes = [2, 96], strides = [1, 1]} : vector<2x128xf32> to vector<2x96xf32>
    %201 = arith.negf %200 : vector<2x96xf32>
    %202 = math.exp %201 : vector<2x96xf32>
    %cst_105 = arith.constant 1.000000e+00 : f32
    %203 = vector.broadcast %cst_105 : f32 to vector<2x96xf32>
    %204 = arith.addf %203, %202 : vector<2x96xf32>
    %205 = arith.divf %203, %204 : vector<2x96xf32>
    %206 = vector.extract_strided_slice %199 {offsets = [0, 96], sizes = [2, 32], strides = [1, 1]} : vector<2x128xf32> to vector<2x32xf32>
    %207 = math.tanh %206 : vector<2x32xf32>
    %208 = vector.extract_strided_slice %205 {offsets = [0, 0], sizes = [2, 32], strides = [1, 1]} : vector<2x96xf32> to vector<2x32xf32>
    %209 = vector.extract_strided_slice %205 {offsets = [0, 32], sizes = [2, 32], strides = [1, 1]} : vector<2x96xf32> to vector<2x32xf32>
    %210 = vector.extract_strided_slice %205 {offsets = [0, 64], sizes = [2, 32], strides = [1, 1]} : vector<2x96xf32> to vector<2x32xf32>
    %c0_106 = arith.constant 0 : index
    %c0_107 = arith.constant 0 : index
    %211 = vector.load %arg7[%c0_106, %c0_107] : memref<2x32xf32, #tpu.memory_space<vmem>>, vector<2x32xf32>
    %212 = arith.mulf %208, %211 : vector<2x32xf32>
    %213 = arith.mulf %209, %207 : vector<2x32xf32>
    %214 = arith.addf %212, %213 : vector<2x32xf32>
    %215 = math.tanh %214 : vector<2x32xf32>
    %216 = arith.mulf %210, %215 : vector<2x32xf32>
    %c0_108 = arith.constant 0 : index
    %c0_109 = arith.constant 0 : index
    %217 = vector.load %arg7[%c0_108, %c0_109] : memref<2x32xf32, #tpu.memory_space<vmem>>, vector<2x32xf32>
    tpu.vector_store %arg7[%c0_108, %c0_109], %214 {strides = array<i32>} : memref<2x32xf32, #tpu.memory_space<vmem>>, vector<2x32xf32>,
    %c0_110 = arith.constant 0 : index
    %c0_111 = arith.constant 0 : index
    %218 = vector.load %arg6[%c0_110, %c0_111] : memref<2x32xf32, #tpu.memory_space<vmem>>, vector<2x32xf32>
    tpu.vector_store %arg6[%c0_110, %c0_111], %216 {strides = array<i32>} : memref<2x32xf32, #tpu.memory_space<vmem>>, vector<2x32xf32>,
    %c8_i32 = arith.constant 8 : i32
    %c0_i32_112 = arith.constant 0 : i32
    %219 = arith.cmpi eq, %arg0, %c0_i32_112 : i32
    %220 = arith.extui %219 : i1 to i32
    %c0_i32_113 = arith.constant 0 : i32
    %221 = arith.cmpi ne, %220, %c0_i32_113 : i32
    scf.if %221 {
      %c0_114 = arith.constant 0 : index
      %c0_115 = arith.constant 0 : index
      %222 = vector.load %arg6[%c0_114, %c0_115] : memref<2x32xf32, #tpu.memory_space<vmem>>, vector<2x32xf32>
      %cst_116 = arith.constant 0.000000e+00 : f32
      %223 = vector.broadcast %cst_116 : f32 to vector<2x32xf32>
      %224 = arith.maximumf %222, %223 : vector<2x32xf32>
      %c0_117 = arith.constant 0 : index
      %c0_118 = arith.constant 0 : index
      %225 = vector.load %arg3[%c0_117, %c0_118] : memref<1x32xf32, #tpu.memory_space<vmem>>, vector<1x32xf32>
      %226 = vector.broadcast %225 : vector<1x32xf32> to vector<2x32xf32>
      %227 = arith.mulf %224, %226 : vector<2x32xf32>
      %cst_119 = arith.constant dense<0.000000e+00> : vector<2xf32>
      %228 = vector.multi_reduction <add>, %227, %cst_119 [1] : vector<2x32xf32> to vector<2xf32>
      %229 = vector.shape_cast %228 : vector<2xf32> to vector<2x1xf32>
      %c0_120 = arith.constant 0 : index
      %c0_121 = arith.constant 0 : index
      %230 = vector.load %arg4[%c0_120, %c0_121] : memref<1x1xf32, #tpu.memory_space<vmem>>, vector<1x1xf32>
      %231 = vector.broadcast %230 : vector<1x1xf32> to vector<2x1xf32>
      %232 = arith.addf %229, %231 : vector<2x1xf32>
      %c0_122 = arith.constant 0 : index
      %c0_123 = arith.constant 0 : index
      %233 = vector.load %arg5[%c0_122, %c0_123] : memref<2x1xf32, #tpu.memory_space<vmem>>, vector<2x1xf32>
      tpu.vector_store %arg5[%c0_122, %c0_123], %232 {strides = array<i32>} : memref<2x1xf32, #tpu.memory_space<vmem>>, vector<2x1xf32>,
    } else {
    }
    return
  }
  func.func @transform_0(%arg0: i32) -> (i32, i32, i32) {
    %c0_i32 = arith.constant 0 : i32
    %c0_i32_0 = arith.constant 0 : i32
    %c0_i32_1 = arith.constant 0 : i32
    return %arg0, %c0_i32, %c0_i32_0 : i32, i32, i32
  }
  func.func @transform_1(%arg0: i32) -> (i32, i32) {
    %c0_i32 = arith.constant 0 : i32
    %c0_i32_0 = arith.constant 0 : i32
    %c0_i32_1 = arith.constant 0 : i32
    return %c0_i32, %c0_i32_0 : i32, i32
  }
  func.func @transform_2(%arg0: i32) -> (i32, i32) {
    %c0_i32 = arith.constant 0 : i32
    %c0_i32_0 = arith.constant 0 : i32
    %c0_i32_1 = arith.constant 0 : i32
    return %c0_i32, %c0_i32_0 : i32, i32
  }
  func.func @transform_3(%arg0: i32) -> (i32, i32) {
    %c0_i32 = arith.constant 0 : i32
    %c0_i32_0 = arith.constant 0 : i32
    %c0_i32_1 = arith.constant 0 : i32
    return %c0_i32, %c0_i32_0 : i32, i32
  }
  func.func @transform_4(%arg0: i32) -> (i32, i32) {
    %c0_i32 = arith.constant 0 : i32
    %c0_i32_0 = arith.constant 0 : i32
    %c0_i32_1 = arith.constant 0 : i32
    return %c0_i32, %c0_i32_0 : i32, i32
  }
}

</mosaic_0001>

<bundles_post_ra>
// kernel: maru_l0_cox_forward.2
= control target key start
LH: loop header
LB: loop body
LE: loop exit
PB: predicated region body
PF: predicated region fallthrough
CT: control target
= control target key end

     0   :  { %s1637_s18 = smov 0   ;;  %s2160_s0 = inlined_call_operand.vmem [shape: f32[16,256], index: 0, kind: input, shape index: {}]   ;;  %s2161_s1 = inlined_call_operand.vmem [shape: bf16[256,512], index: 1, kind: input, shape index: {}]   ;;  %s2162_s2 = inlined_call_operand.vmem [shape: f32[1,512], index: 2, kind: input, shape index: {}]   ;;  %s2163_s3 = inlined_call_operand.vmem [shape: bf16[512,128], index: 3, kind: input, shape index: {}]   ;;  %s2164_s4 = inlined_call_operand.vmem [shape: f32[1,128], index: 4, kind: input, shape index: {}]   ;;  %s2165_s5 = inlined_call_operand.vmem [shape: f32[16,128], index: 5, kind: output, shape index: {}]  }
   0x1 LB: > { %s1099_s19 = sadd.s32 4294967295, %s1605_s18   ;;  %p1103_p0 = scmp.ge.s32.totalorder %s1605_s18, 1  ;;  %s1605_s18 = sphi %s1637_s18, %s15_s18  }
   0x2   : > { %p187_p1 = scmp.lt.s32.totalorder %s1605_s18, 3 }
   0x4   : > { %p188_p2 = pnand %p1103_p0, %p187_p1 }
   0x5   : > { %p214_p3 = scmp.lt.s32.totalorder (!%p188_p2), %s1099_s19, 1 }
   0x6   : > { %191 = sbr.rel (%p188_p2) target bundleno = 359 (0x167), region = 40 }
   0xb   : > { %v1221_v0 = vld [vmem:[%s2161_s1 + $0xe0] sm:$0xf]  ;;  %v1524_v1 = vld [vmem:[%s2161_s1 + $0xec] sm:$0xf0]  ;;  %v1522_v5 = vld [vmem:[%s2161_s1 + $0xe4] sm:$0xf] }
   0xc   : > { %v1349_v2 = vld [vmem:[%s2161_s1 + $0x1e0] sm:$0xf]  ;;  %v1222_v3 = vor.u32 %v1524_v1, %v1221_v0  ;;  %v1556_v4 = vld [vmem:[%s2161_s1 + $0x1ec] sm:$0xf0]  ;;  %v1223_v6 = vld [vmem:[%s2161_s1 + $0xf0] sm:$0xf0] }
   0xd   : > { %v1350_v7 = vor.u32 %v1556_v4, %v1349_v2  ;;  %v1226_v8 = vor.u32 %v1522_v5, %v1223_v6  ;;  %v1554_v9 = vld [vmem:[%s2161_s1 + $0x1e4] sm:$0xf]  ;;  %v1351_v10 = vld [vmem:[%s2161_s1 + $0x1f0] sm:$0xf0]  ;;  %v1205_v11 = vld [vmem:[%s2161_s1 + $0xc0] sm:$0xf] }
   0xe   : > { %621 = vmatpush.bf16.msra.mxu0 %v1222_v3  ;;  %v1354_v12 = vor.u32 %v1554_v9, %v1351_v10  ;;  %v1520_v13 = vld [vmem:[%s2161_s1 + $0xcc] sm:$0xf0]  ;;  %v1333_v14 = vld [vmem:[%s2161_s1 + $0x1c0] sm:$0xf]  ;;  %v1518_v18 = vld [vmem:[%s2161_s1 + $0xc4] sm:$0xf] }
   0xf   : > { %v1552_v15 = vld [vmem:[%s2161_s1 + $0x1cc] sm:$0xf0]  ;;  %634 = vmatpush.bf16.msra.mxu1 %v1350_v7  ;;  %647 = vmatpush.bf16.msra.mxu2 %v1226_v8  ;;  %v1206_v16 = vor.u32 %v1520_v13, %v1205_v11  ;;  %v1207_v19 = vld [vmem:[%s2161_s1 + $0xd0] sm:$0xf0]  ;;  %v1550_v20 = vld [vmem:[%s2161_s1 + $0x1c4] sm:$0xf] }
  0x10   : > { %v1334_v17 = vor.u32 %v1552_v15, %v1333_v14  ;;  %660 = vmatpush.bf16.msra.mxu3 %v1354_v12  ;;  %v1210_v21 = vor.u32 %v1518_v18, %v1207_v19  ;;  %v1335_v22 = vld [vmem:[%s2161_s1 + $0x1d0] sm:$0xf0]  ;;  %v1189_v23 = vld [vmem:[%s2161_s1 + $0xa0] sm:$0xf]  ;;  %v1516_v24 = vld [vmem:[%s2161_s1 + $0xac] sm:$0xf0] }
  0x11   : > { %v1338_v25 = vor.u32 %v1550_v20, %v1335_v22  ;;  %v1317_v26 = vld [vmem:[%s2161_s1 + $0x1a0] sm:$0xf]  ;;  %v1548_v27 = vld [vmem:[%s2161_s1 + $0x1ac] sm:$0xf0]  ;;  %v1514_v28 = vld [vmem:[%s2161_s1 + $0xa4] sm:$0xf]  ;;  %v1190_v29 = vor.u32 %v1516_v24, %v1189_v23 }
  0x12   : > { %622 = vmatpush.bf16.msra.mxu0 %v1206_v16  ;;  %v1191_v30 = vld [vmem:[%s2161_s1 + $0xb0] sm:$0xf0]  ;;  %v1546_v31 = vld [vmem:[%s2161_s1 + $0x1a4] sm:$0xf]  ;;  %v1318_v33 = vor.u32 %v1548_v27, %v1317_v26  ;;  %v1173_v35 = vld [vmem:[%s2161_s1 + $0x80] sm:$0xf] }
  0x13   : > { %v1319_v32 = vld [vmem:[%s2161_s1 + $0x1b0] sm:$0xf0]  ;;  %635 = vmatpush.bf16.msra.mxu1 %v1334_v17  ;;  %648 = vmatpush.bf16.msra.mxu2 %v1210_v21  ;;  %v1194_v34 = vor.u32 %v1514_v28, %v1191_v30  ;;  %v1512_v36 = vld [vmem:[%s2161_s1 + $0x8c] sm:$0xf0]  ;;  %v1301_v37 = vld [vmem:[%s2161_s1 + $0x180] sm:$0xf] }
  0x14   : > { %661 = vmatpush.bf16.msra.mxu3 %v1338_v25  ;;  %v1322_v38 = vor.u32 %v1546_v31, %v1319_v32  ;;  %v1544_v39 = vld [vmem:[%s2161_s1 + $0x18c] sm:$0xf0]  ;;  %v1510_v40 = vld [vmem:[%s2161_s1 + $0x84] sm:$0xf]  ;;  %v1175_v41 = vld [vmem:[%s2161_s1 + $0x90] sm:$0xf0]  ;;  %v1174_v44 = vor.u32 %v1512_v36, %v1173_v35 }
  0x15   : > { %v1542_v42 = vld [vmem:[%s2161_s1 + $0x184] sm:$0xf]  ;;  %v1303_v43 = vld [vmem:[%s2161_s1 + $0x190] sm:$0xf0]  ;;  %v1302_v45 = vor.u32 %v1544_v39, %v1301_v37  ;;  %v1178_v46 = vor.u32 %v1510_v40, %v1175_v41  ;;  %v1157_v47 = vld [vmem:[%s2161_s1 + $0x60] sm:$0xf] }
  0x16   : > { %623 = vmatpush.bf16.msra.mxu0 %v1190_v29  ;;  %v1508_v48 = vld [vmem:[%s2161_s1 + $0x6c] sm:$0xf0]  ;;  %v1285_v49 = vld [vmem:[%s2161_s1 + $0x160] sm:$0xf]  ;;  %v1306_v50 = vor.u32 %v1542_v42, %v1303_v43  ;;  %v1506_v52 = vld [vmem:[%s2161_s1 + $0x64] sm:$0xf] }
  0x17   : > { %636 = vmatpush.bf16.msra.mxu1 %v1318_v33  ;;  %649 = vmatpush.bf16.msra.mxu2 %v1194_v34  ;;  %v1540_v51 = vld [vmem:[%s2161_s1 + $0x16c] sm:$0xf0]  ;;  %v1159_v53 = vld [vmem:[%s2161_s1 + $0x70] sm:$0xf0]  ;;  %v1538_v54 = vld [vmem:[%s2161_s1 + $0x164] sm:$0xf]  ;;  %v1158_v56 = vor.u32 %v1508_v48, %v1157_v47 }
  0x18   : > { %662 = vmatpush.bf16.msra.mxu3 %v1322_v38  ;;  %v1287_v55 = vld [vmem:[%s2161_s1 + $0x170] sm:$0xf0]  ;;  %v1286_v57 = vor.u32 %v1540_v51, %v1285_v49  ;;  %v1162_v58 = vor.u32 %v1506_v52, %v1159_v53  ;;  %v1141_v59 = vld [vmem:[%s2161_s1 + $0x40] sm:$0xf]  ;;  %v1504_v60 = vld [vmem:[%s2161_s1 + $0x4c] sm:$0xf0] }
  0x19   : > { %v1269_v61 = vld [vmem:[%s2161_s1 + $0x140] sm:$0xf]  ;;  %v1290_v62 = vor.u32 %v1538_v54, %v1287_v55  ;;  %v1536_v63 = vld [vmem:[%s2161_s1 + $0x14c] sm:$0xf0]  ;;  %v1502_v0 = vld [vmem:[%s2161_s1 + $0x44] sm:$0xf]  ;;  %v1142_v4 = vor.u32 %v1504_v60, %v1141_v59 }
  0x1a   : > { %624 = vmatpush.bf16.msra.mxu0 %v1174_v44  ;;  %v1143_v1 = vld [vmem:[%s2161_s1 + $0x50] sm:$0xf0]  ;;  %v1534_v2 = vld [vmem:[%s2161_s1 + $0x144] sm:$0xf]  ;;  %v1270_v5 = vor.u32 %v1536_v63, %v1269_v61  ;;  %v1125_v7 = vld [vmem:[%s2161_s1 + $0x20] sm:$0xf] }
  0x1b   : > { %637 = vmatpush.bf16.msra.mxu1 %v1302_v45  ;;  %650 = vmatpush.bf16.msra.mxu2 %v1178_v46  ;;  %v1271_v3 = vld [vmem:[%s2161_s1 + $0x150] sm:$0xf0]  ;;  %v1146_v6 = vor.u32 %v1502_v0, %v1143_v1  ;;  %v1500_v8 = vld [vmem:[%s2161_s1 + $0x2c] sm:$0xf0]  ;;  %v1253_v9 = vld [vmem:[%s2161_s1 + $0x120] sm:$0xf] }
  0x1c   : > { %663 = vmatpush.bf16.msra.mxu3 %v1306_v50  ;;  %v1274_v10 = vor.u32 %v1534_v2, %v1271_v3  ;;  %v1532_v11 = vld [vmem:[%s2161_s1 + $0x12c] sm:$0xf0]  ;;  %v1498_v12 = vld [vmem:[%s2161_s1 + $0x24] sm:$0xf]  ;;  %v1127_v13 = vld [vmem:[%s2161_s1 + $0x30] sm:$0xf0]  ;;  %v1126_v16 = vor.u32 %v1500_v8, %v1125_v7 }
  0x1d   : > { %v1530_v14 = vld [vmem:[%s2161_s1 + $0x124] sm:$0xf]  ;;  %v1255_v15 = vld [vmem:[%s2161_s1 + $0x130] sm:$0xf0]  ;;  %v1109_v17 = vld [vmem:[%s2161_s1] sm:$0xf]  ;;  %v1254_v20 = vor.u32 %v1532_v11, %v1253_v9  ;;  %v1130_v21 = vor.u32 %v1498_v12, %v1127_v13 }
  0x1e   : > { %625 = vmatpush.bf16.msra.mxu0 %v1158_v56  ;;  %v1496_v18 = vld [vmem:[%s2161_s1 + $0xc] sm:$0xf0]  ;;  %v1237_v19 = vld [vmem:[%s2161_s1 + $0x100] sm:$0xf]  ;;  %v1494_v23 = vld [vmem:[%s2161_s1 + $0x4] sm:$0xf]  ;;  %v1258_v25 = vor.u32 %v1530_v14, %v1255_v15 }
  0x1f   : > { %638 = vmatpush.bf16.msra.mxu1 %v1286_v57  ;;  %651 = vmatpush.bf16.msra.mxu2 %v1162_v58  ;;  %v1528_v22 = vld [vmem:[%s2161_s1 + $0x10c] sm:$0xf0]  ;;  %v1111_v24 = vld [vmem:[%s2161_s1 + $0x10] sm:$0xf0]  ;;  %v1526_v26 = vld [vmem:[%s2161_s1 + $0x104] sm:$0xf]  ;;  %v1110_v31 = vor.u32 %v1496_v18, %v1109_v17 }
  0x20   : > { %664 = vmatpush.bf16.msra.mxu3 %v1290_v62  ;;  %v1239_v27 = vld [vmem:[%s2161_s1 + $0x110] sm:$0xf0]  ;;  %v1229_v28 = vld [vmem:[%s2161_s1 + $0xe8] sm:$0xf]  ;;  %v1525_v29 = vld [vmem:[%s2161_s1 + $0xf4] sm:$0xf0]  ;;  %v1238_v35 = vor.u32 %v1528_v22, %v1237_v19  ;;  %v1114_v36 = vor.u32 %v1494_v23, %v1111_v24 }
  0x21   : > { %v1357_v30 = vld [vmem:[%s2161_s1 + $0x1e8] sm:$0xf]  ;;  %v1557_v32 = vld [vmem:[%s2161_s1 + $0x1f4] sm:$0xf0]  ;;  %v1523_v33 = vld [vmem:[%s2161_s1 + $0xec] sm:$0xf]  ;;  %v1242_v39 = vor.u32 %v1526_v26, %v1239_v27  ;;  %v1230_v40 = vor.u32 %v1525_v29, %v1229_v28 }
  0x22   : > { %626 = vmatpush.bf16.msra.mxu0 %v1142_v4  ;;  %v1231_v34 = vld [vmem:[%s2161_s1 + $0xf8] sm:$0xf0]  ;;  %v1555_v37 = vld [vmem:[%s2161_s1 + $0x1ec] sm:$0xf]  ;;  %s2167_s19 = smov (!%p214_p3, %s1099_s19), 1  ;;  %v1358_v43 = vor.u32 %v1557_v32, %v1357_v30 }
  0x23   : > { %639 = vmatpush.bf16.msra.mxu1 %v1270_v5  ;;  %652 = vmatpush.bf16.msra.mxu2 %v1146_v6  ;;  %v1359_v38 = vld [vmem:[%s2161_s1 + $0x1f8] sm:$0xf0]  ;;  %v1213_v41 = vld [vmem:[%s2161_s1 + $0xc8] sm:$0xf]  ;;  %v1521_v42 = vld [vmem:[%s2161_s1 + $0xd4] sm:$0xf0]  ;;  %v1234_v44 = vor.u32 %v1523_v33, %v1231_v34 }
  0x24   : > { %665 = vmatpush.bf16.msra.mxu3 %v1274_v10  ;;  %v1341_v45 = vld [vmem:[%s2161_s1 + $0x1c8] sm:$0xf]  ;;  %v1553_v46 = vld [vmem:[%s2161_s1 + $0x1d4] sm:$0xf0]  ;;  %s1493_s9 = sshll.u32 %s2167_s19, 4  ;;  %v1362_v47 = vor.u32 %v1555_v37, %v1359_v38  ;;  %v1214_v54 = vor.u32 %v1521_v42, %v1213_v41  ;;  %s1106_s26 = sshll.u32 %s2167_s19, 3 }
  0x25   : > { %v1519_v48 = vld [vmem:[%s2161_s1 + $0xcc] sm:$0xf]  ;;  %v1215_v49 = vld [vmem:[%s2161_s1 + $0xd8] sm:$0xf0]  ;;  %s218_s20 = scalar_lea.vmem %s2160_s0, %s1493_s9  ;;  %v1342_v57 = vor.u32 %v1553_v46, %v1341_v45  ;;  %v1197_v59 = vld [vmem:[%s2161_s1 + $0xa8] sm:$0xf]  ;;  %s222_s29 = scalar_lea.vmem %s2165_s5, %s1106_s26 }
  0x26   : > { %627 = vmatpush.bf16.msra.mxu0 %v1126_v16  ;;  %v1551_v50 = vld [vmem:[%s2161_s1 + $0x1cc] sm:$0xf]  ;;  %v1343_v51 = vld [vmem:[%s2161_s1 + $0x1d8] sm:$0xf0]  ;;  %v223_v52 = vld [vmem:[%s218_s20] sm:$0xff]  ;;  %v1218_v58 = vor.u32 %v1519_v48, %v1215_v49 }
  0x27   : > { %640 = vmatpush.bf16.msra.mxu1 %v1254_v20  ;;  %653 = vmatpush.bf16.msra.mxu2 %v1130_v21  ;;  %v224_v53 = vld [vmem:[%s218_s20 + $0x8] sm:$0xff]  ;;  %v1895_v55 = vpack.c.bf16 %v223_v52, %v223_v52  ;;  %v1517_v60 = vld [vmem:[%s2161_s1 + $0xb4] sm:$0xf0]  ;;  %v1346_v62 = vor.u32 %v1551_v50, %v1343_v51  ;;  %v1199_v1 = vld [vmem:[%s2161_s1 + $0xb8] sm:$0xf0] }
  0x28   : > { %666 = vmatpush.bf16.msra.mxu3 %v1258_v25  ;;  %v1897_v56 = vpack.c.bf16 %v224_v53, %v224_v53  ;;  %v1325_v61 = vld [vmem:[%s2161_s1 + $0x1a8] sm:$0xf]  ;;  %v1549_v63 = vld [vmem:[%s2161_s1 + $0x1b4] sm:$0xf0]  ;;  %v1515_v0 = vld [vmem:[%s2161_s1 + $0xac] sm:$0xf]  ;;  %v1198_v4 = vor.u32 %v1517_v60, %v1197_v59 }
  0x29   : > { %v1547_v2 = vld [vmem:[%s2161_s1 + $0x1ac] sm:$0xf]  ;;  %v1327_v3 = vld [vmem:[%s2161_s1 + $0x1b8] sm:$0xf0]  ;;  %v1326_v5 = vor.u32 %v1549_v63, %v1325_v61  ;;  %v1202_v6 = vor.u32 %v1515_v0, %v1199_v1  ;;  %v1181_v7 = vld [vmem:[%s2161_s1 + $0x88] sm:$0xf] }
  0x2a   : > { %628 = vmatpush.bf16.msra.mxu0 %v1110_v31  ;;  %v1513_v8 = vld [vmem:[%s2161_s1 + $0x94] sm:$0xf0]  ;;  %v1309_v9 = vld [vmem:[%s2161_s1 + $0x188] sm:$0xf]  ;;  %v1330_v10 = vor.u32 %v1547_v2, %v1327_v3  ;;  %v1511_v12 = vld [vmem:[%s2161_s1 + $0x8c] sm:$0xf] }
  0x2b   : > { %641 = vmatpush.bf16.msra.mxu1 %v1238_v35  ;;  %654 = vmatpush.bf16.msra.mxu2 %v1114_v36  ;;  %v1545_v11 = vld [vmem:[%s2161_s1 + $0x194] sm:$0xf0]  ;;  %v1183_v13 = vld [vmem:[%s2161_s1 + $0x98] sm:$0xf0]  ;;  %v1543_v14 = vld [vmem:[%s2161_s1 + $0x18c] sm:$0xf]  ;;  %v1182_v16 = vor.u32 %v1513_v8, %v1181_v7 }
  0x2c   : > { %667 = vmatpush.bf16.msra.mxu3 %v1242_v39  ;;  %v1311_v15 = vld [vmem:[%s2161_s1 + $0x198] sm:$0xf0]  ;;  %v1310_v17 = vor.u32 %v1545_v11, %v1309_v9  ;;  %v1186_v18 = vor.u32 %v1511_v12, %v1183_v13  ;;  %v1165_v19 = vld [vmem:[%s2161_s1 + $0x68] sm:$0xf]  ;;  %v1509_v20 = vld [vmem:[%s2161_s1 + $0x74] sm:$0xf0] }
  0x2d   : > { %629 = vmatmul.bf16.vlgmr.msra.gmra.mxu0 %v1895_v55  ;;  %v1293_v21 = vld [vmem:[%s2161_s1 + $0x168] sm:$0xf]  ;;  %v1314_v22 = vor.u32 %v1543_v14, %v1311_v15  ;;  %v1541_v23 = vld [vmem:[%s2161_s1 + $0x174] sm:$0xf0]  ;;  %v1507_v24 = vld [vmem:[%s2161_s1 + $0x6c] sm:$0xf]  ;;  %v1166_v28 = vor.u32 %v1509_v20, %v1165_v19 }
  0x2e   : > { %673 = vmatpush.bf16.msrb.mxu0 %v1230_v40  ;;  %655 = vmatmul.bf16.vlgmr.msra.gmra.mxu2 %v1895_v55  ;;  %v1167_v25 = vld [vmem:[%s2161_s1 + $0x78] sm:$0xf0]  ;;  %v1539_v26 = vld [vmem:[%s2161_s1 + $0x16c] sm:$0xf]  ;;  %v1149_v29 = vld [vmem:[%s2161_s1 + $0x48] sm:$0xf]  ;;  %v1294_v30 = vor.u32 %v1541_v23, %v1293_v21 }
  0x2f   : > { %686 = vmatpush.bf16.msrb.mxu1 %v1358_v43  ;;  %699 = vmatpush.bf16.msrb.mxu2 %v1234_v44  ;;  %v1295_v27 = vld [vmem:[%s2161_s1 + $0x178] sm:$0xf0]  ;;  %v1170_v31 = vor.u32 %v1507_v24, %v1167_v25  ;;  %v1505_v32 = vld [vmem:[%s2161_s1 + $0x54] sm:$0xf0]  ;;  %v1277_v33 = vld [vmem:[%s2161_s1 + $0x148] sm:$0xf] }
  0x30   : > { %712 = vmatpush.bf16.msrb.mxu3 %v1362_v47  ;;  %642 = vmatmul.bf16.vlgmr.msra.gmra.mxu1 %v1897_v56  ;;  %v1537_v34 = vld [vmem:[%s2161_s1 + $0x154] sm:$0xf0]  ;;  %v1298_v35 = vor.u32 %v1539_v26, %v1295_v27  ;;  %v1503_v36 = vld [vmem:[%s2161_s1 + $0x4c] sm:$0xf]  ;;  %v1151_v37 = vld [vmem:[%s2161_s1 + $0x58] sm:$0xf0]  ;;  %v1150_v40 = vor.u32 %v1505_v32, %v1149_v29 }
  0x31   : > { %668 = vmatmul.bf16.vlgmr.msra.gmra.mxu3 %v1897_v56  ;;  %v1535_v38 = vld [vmem:[%s2161_s1 + $0x14c] sm:$0xf]  ;;  %v1279_v39 = vld [vmem:[%s2161_s1 + $0x158] sm:$0xf0]  ;;  %v1278_v41 = vor.u32 %v1537_v34, %v1277_v33  ;;  %v1154_v42 = vor.u32 %v1503_v36, %v1151_v37  ;;  %v1133_v43 = vld [vmem:[%s2161_s1 + $0x28] sm:$0xf] }
  0x32   : > { %674 = vmatpush.bf16.msrb.mxu0 %v1214_v54  ;;  %v1501_v44 = vld [vmem:[%s2161_s1 + $0x34] sm:$0xf0]  ;;  %v1261_v45 = vld [vmem:[%s2161_s1 + $0x128] sm:$0xf]  ;;  %v1282_v46 = vor.u32 %v1535_v38, %v1279_v39  ;;  %v1499_v48 = vld [vmem:[%s2161_s1 + $0x2c] sm:$0xf] }
  0x33   : > { %687 = vmatpush.bf16.msrb.mxu1 %v1342_v57  ;;  %700 = vmatpush.bf16.msrb.mxu2 %v1218_v58  ;;  %v1533_v47 = vld [vmem:[%s2161_s1 + $0x134] sm:$0xf0]  ;;  %v1135_v49 = vld [vmem:[%s2161_s1 + $0x38] sm:$0xf0]  ;;  %v1531_v50 = vld [vmem:[%s2161_s1 + $0x12c] sm:$0xf]  ;;  %v1134_v52 = vor.u32 %v1501_v44, %v1133_v43 }
  0x34   : > { %713 = vmatpush.bf16.msrb.mxu3 %v1346_v62  ;;  %v1263_v51 = vld [vmem:[%s2161_s1 + $0x138] sm:$0xf0]  ;;  %v1262_v53 = vor.u32 %v1533_v47, %v1261_v45  ;;  %v1138_v54 = vor.u32 %v1499_v48, %v1135_v49  ;;  %v1117_v57 = vld [vmem:[%s2161_s1 + $0x8] sm:$0xf]  ;;  %v1497_v58 = vld [vmem:[%s2161_s1 + $0x14] sm:$0xf0] }
  0x35   : > { %v1245_v59 = vld [vmem:[%s2161_s1 + $0x108] sm:$0xf]  ;;  %v1266_v60 = vor.u32 %v1531_v50, %v1263_v51  ;;  %v1529_v61 = vld [vmem:[%s2161_s1 + $0x114] sm:$0xf0]  ;;  %v1495_v62 = vld [vmem:[%s2161_s1 + $0xc] sm:$0xf]  ;;  %v1118_v2 = vor.u32 %v1497_v58, %v1117_v57 }
  0x36   : > { %675 = vmatpush.bf16.msrb.mxu0 %v1198_v4  ;;  %v1119_v63 = vld [vmem:[%s2161_s1 + $0x18] sm:$0xf0]  ;;  %v1527_v0 = vld [vmem:[%s2161_s1 + $0x10c] sm:$0xf]  ;;  %v1246_v3 = vor.u32 %v1529_v61, %v1245_v59  ;;  %v1564_v9 = vld [vmem:[%s2163_s3 + $0x30] sm:$0xff] }
  0x37   : > { %688 = vmatpush.bf16.msrb.mxu1 %v1326_v5  ;;  %701 = vmatpush.bf16.msrb.mxu2 %v1202_v6  ;;  %v1247_v1 = vld [vmem:[%s2161_s1 + $0x118] sm:$0xf0]  ;;  %v1122_v4 = vor.u32 %v1495_v62, %v1119_v63  ;;  %v1563_v11 = vld [vmem:[%s2163_s3 + $0x28] sm:$0xff]  ;;  %v1562_v13 = vld [vmem:[%s2163_s3 + $0x20] sm:$0xff] }
  0x38   : > { %714 = vmatpush.bf16.msrb.mxu3 %v1330_v10  ;;  %v1250_v5 = vor.u32 %v1527_v0, %v1247_v1  ;;  %v1565_v6 = vld [vmem:[%s2163_s3 + $0x38] sm:$0xff]  ;;  %v1572_v10 = vld [vmem:[%s2163_s3 + $0x70] sm:$0xff]  ;;  %v1571_v12 = vld [vmem:[%s2163_s3 + $0x68] sm:$0xff] }
  0x39   : > { %v1573_v7 = vld [vmem:[%s2163_s3 + $0x78] sm:$0xff]  ;;  %v1560_v15 = vld [vmem:[%s2163_s3 + $0x10] sm:$0xff]  ;;  %v1567_v19 = vld [vmem:[%s2163_s3 + $0x48] sm:$0xff] }
  0x3a   : > { %676 = vmatpush.bf16.msrb.mxu0 %v1182_v16  ;;  %v1581_v8 = vld [vmem:[%s2163_s3 + $0xb8] sm:$0xff]  ;;  %v1568_v16 = vld [vmem:[%s2163_s3 + $0x50] sm:$0xff]  ;;  %v1579_v21 = vld [vmem:[%s2163_s3 + $0xa8] sm:$0xff] }
  0x3b   : > { %689 = vmatpush.bf16.msrb.mxu1 %v1310_v17  ;;  %702 = vmatpush.bf16.msrb.mxu2 %v1186_v18  ;;  %v1569_v14 = vld [vmem:[%s2163_s3 + $0x58] sm:$0xff]  ;;  %v1580_v17 = vld [vmem:[%s2163_s3 + $0xb0] sm:$0xff]  ;;  %v1559_v18 = vld [vmem:[%s2163_s3 + $0x8] sm:$0xff] }
  0x3c   : > { %715 = vmatpush.bf16.msrb.mxu3 %v1314_v22  ;;  %v1589_v20 = vld [vmem:[%s2163_s3 + $0xf8] sm:$0xff]  ;;  %v1558_v22 = vld [vmem:[%s2163_s3] sm:$0xff]  ;;  %v1588_v24 = vld [vmem:[%s2163_s3 + $0xf0] sm:$0xff] }
  0x3d   : > { %v1566_v23 = vld [vmem:[%s2163_s3 + $0x40] sm:$0xff]  ;;  %v1587_v26 = vld [vmem:[%s2163_s3 + $0xe8] sm:$0xff]  ;;  %v1577_v27 = vld [vmem:[%s2163_s3 + $0x98] sm:$0xff] }
  0x3e   : > { %677 = vmatpush.bf16.msrb.mxu0 %v1166_v28  ;;  %v1578_v25 = vld [vmem:[%s2163_s3 + $0xa0] sm:$0xff]  ;;  %v1576_v29 = vld [vmem:[%s2163_s3 + $0x90] sm:$0xff]  ;;  %v1575_v33 = vld [vmem:[%s2163_s3 + $0x88] sm:$0xff] }
  0x3f   : > { %690 = vmatpush.bf16.msrb.mxu1 %v1294_v30  ;;  %703 = vmatpush.bf16.msrb.mxu2 %v1170_v31  ;;  %v1586_v28 = vld [vmem:[%s2163_s3 + $0xe0] sm:$0xff]  ;;  %v1585_v31 = vld [vmem:[%s2163_s3 + $0xd8] sm:$0xff] }
  0x40   : > { %716 = vmatpush.bf16.msrb.mxu3 %v1298_v35  ;;  %v291_v30 = vld [vmem:[%s2162_s2] sm:$0xf]  ;;  %v1584_v35 = vld [vmem:[%s2163_s3 + $0xd0] sm:$0xff] }
  0x41   : > { %v293_v32 = vperm.slane %v291_v30, 0  ;;  %v294_v38 = vperm.slane %v291_v30, 1  ;;  %v1574_v39 = vld [vmem:[%s2163_s3 + $0x80] sm:$0xff]  ;;  %v295_v57 = vperm.slane %v291_v30, 2  ;;  %v296_v62 = vperm.slane %v291_v30, 3 }
  0x42   : > { %678 = vmatpush.bf16.msrb.mxu0 %v1150_v40  ;;  %v1582_v49 = vld [vmem:[%s2163_s3 + $0xc0] sm:$0xff] }
  0x43   : > { %691 = vmatpush.bf16.msrb.mxu1 %v1278_v41  ;;  %704 = vmatpush.bf16.msrb.mxu2 %v1154_v42  ;;  %v1583_v41 = vld [vmem:[%s2163_s3 + $0xc8] sm:$0xff] }
  0x44   : > { %717 = vmatpush.bf16.msrb.mxu3 %v1282_v46 }
  0x46   : > { %679 = vmatpush.bf16.msrb.mxu0 %v1134_v52 }
  0x47   : > { %692 = vmatpush.bf16.msrb.mxu1 %v1262_v53  ;;  %705 = vmatpush.bf16.msrb.mxu2 %v1138_v54 }
  0x48   : > { %718 = vmatpush.bf16.msrb.mxu3 %v1266_v60 }
  0x4a   : > { %680 = vmatpush.bf16.msrb.mxu0 %v1118_v2 }
  0x4b   : > { %693 = vmatpush.bf16.msrb.mxu1 %v1246_v3  ;;  %706 = vmatpush.bf16.msrb.mxu2 %v1122_v4 }
  0x4c   : > { %719 = vmatpush.bf16.msrb.mxu3 %v1250_v5 }
  0x4d   : > { %681 = vmatmul.bf16.vlgmr.msrb.gmra.mxu0 %v1895_v55 }
  0x4e   : > { %993 = vmatpush.bf16.msra.mxu0 %v1565_v6  ;;  %694 = vmatmul.bf16.vlgmr.msrb.gmra.mxu1 %v1897_v56 }
  0x4f   : > { %1006 = vmatpush.bf16.msra.mxu1 %v1573_v7  ;;  %707 = vmatmul.bf16.vlgmr.msrb.gmra.mxu2 %v1895_v55  ;;  %v1570_v55 = vld [vmem:[%s2163_s3 + $0x60] sm:$0xff] }
  0x50   : > { %720 = vmatmul.bf16.vlgmr.msrb.gmra.mxu3 %v1897_v56  ;;  %1019 = vmatpush.bf16.msra.mxu2 %v1581_v8  ;;  %v1561_v56 = vld [vmem:[%s2163_s3 + $0x18] sm:$0xff] }
  0x51   : > { %1032 = vmatpush.bf16.msra.mxu3 %v1589_v20 }
  0x52   : > { %994 = vmatpush.bf16.msra.mxu0 %v1564_v9 }
  0x53   : > { %1007 = vmatpush.bf16.msra.mxu1 %v1572_v10 }
  0x54   : > { %1020 = vmatpush.bf16.msra.mxu2 %v1580_v17 }
  0x55   : > { %1033 = vmatpush.bf16.msra.mxu3 %v1588_v24 }
  0x56   : > { %995 = vmatpush.bf16.msra.mxu0 %v1563_v11 }
  0x57   : > { %1008 = vmatpush.bf16.msra.mxu1 %v1571_v12 }
  0x58   : > { %1021 = vmatpush.bf16.msra.mxu2 %v1579_v21 }
  0x59   : > { %1034 = vmatpush.bf16.msra.mxu3 %v1587_v26 }
  0x5a   : > { %996 = vmatpush.bf16.msra.mxu0 %v1562_v13 }
  0x5b   : > { %1009 = vmatpush.bf16.msra.mxu1 %v1570_v55 }
  0x5c   : > { %1022 = vmatpush.bf16.msra.mxu2 %v1578_v25 }
  0x5d   : > { %1035 = vmatpush.bf16.msra.mxu3 %v1586_v28 }
  0x5e   : > { %997 = vmatpush.bf16.msra.mxu0 %v1561_v56  ;;  %v1598_v56 = vld [vmem:[%s2164_s4] ss:$0 sm:$0xff] }
  0x5f   : > { %1010 = vmatpush.bf16.msra.mxu1 %v1569_v14 }
  0x60   : > { %1023 = vmatpush.bf16.msra.mxu2 %v1577_v27 }
  0x61   : > { %1036 = vmatpush.bf16.msra.mxu3 %v1585_v31 }
  0x62   : > { %998 = vmatpush.bf16.msra.mxu0 %v1560_v15 }
  0x63   : > { %1011 = vmatpush.bf16.msra.mxu1 %v1568_v16 }
  0x64   : > { %1024 = vmatpush.bf16.msra.mxu2 %v1576_v29 }
  0x65   : > { %1037 = vmatpush.bf16.msra.mxu3 %v1584_v35 }
  0x66   : > { %999 = vmatpush.bf16.msra.mxu0 %v1559_v18 }
  0x67   : > { %1012 = vmatpush.bf16.msra.mxu1 %v1567_v19 }
  0x68   : > { %1025 = vmatpush.bf16.msra.mxu2 %v1575_v33 }
  0x69   : > { %1038 = vmatpush.bf16.msra.mxu3 %v1583_v41 }
  0x6a   : > { %1000 = vmatpush.bf16.msra.mxu0 %v1558_v22 }
  0x6b   : > { %1013 = vmatpush.bf16.msra.mxu1 %v1566_v23 }
  0x6c   : > { %1026 = vmatpush.bf16.msra.mxu2 %v1574_v39 }
  0x6d   : > { %1039 = vmatpush.bf16.msra.mxu3 %v1582_v49 }
  0xaa   : > { %v630_v34 = vpop.f32.mrf.mxu0 }
  0xab   : > { %v631_v36 = vadd.f32 %v630_v34, %v293_v32 }
  0xad   : > { %v643_v37 = vpop.f32.mrf.mxu1 }
  0xae   : > { %v644_v40 = vadd.f32 %v643_v37, %v631_v36 }
  0xb0   : > { %v725_v43 = vmax.f32 %v644_v40, 0.0 }
  0xb1   : > { %v656_v42 = vpop.f32.mrf.mxu2 }
  0xb2   : > { %v657_v44 = vadd.f32 %v656_v42, %v294_v38  ;;  %v729_v46 = vpack.c.bf16 %v725_v43, %v725_v43  ;;  %v632_v48 = vpop.f32.mrf.mxu0 }
  0xb4   : > { %v669_v45 = vpop.f32.mrf.mxu3  ;;  %1001 = vmatmul.bf16.vlgmr.msra.gmra.mxu0 %v729_v46 }
  0xb5   : > { %v670_v47 = vadd.f32 %v669_v45, %v657_v44  ;;  %v645_v50 = vpop.f32.mrf.mxu1 }
  0xb7   : > { %v726_v51 = vmax.f32 %v670_v47, 0.0 }
  0xb9   : > { %v730_v52 = vpack.c.bf16 %v726_v51, %v726_v51  ;;  %v658_v53 = vpop.f32.mrf.mxu2 }
  0xbb   : > { %1014 = vmatmul.bf16.vlgmr.msra.gmra.mxu1 %v730_v52 }
  0xbc   : > { %v671_v54 = vpop.f32.mrf.mxu3 }
  0xca   : > { %v682_v58 = vpop.f32.mrf.mxu0 }
  0xcb   : > { %v683_v59 = vadd.f32 %v682_v58, %v295_v57  ;;  %v695_v60 = vpop.f32.mrf.mxu1 }
  0xcd   : > { %v696_v61 = vadd.f32 %v695_v60, %v683_v59 }
  0xcf   : > { %v727_v63 = vmax.f32 %v696_v61, 0.0 }
  0xd1   : > { %v731_v0 = vpack.c.bf16 %v727_v63, %v727_v63 }
  0xd2   : > { %v708_v1 = vpop.f32.mrf.mxu2  ;;  %v684_v4 = vpop.f32.mrf.mxu0 }
  0xd3   : > { %v709_v2 = vadd.f32 %v708_v1, %v296_v62  ;;  %v721_v3 = vpop.f32.mrf.mxu3  ;;  %v697_v5 = vpop.f32.mrf.mxu1  ;;  %1027 = vmatmul.bf16.vlgmr.msra.gmra.mxu2 %v731_v0 }
  0xd5   : > { %v722_v6 = vadd.f32 %v721_v3, %v709_v2 }
  0xd7   : > { %v728_v7 = vmax.f32 %v722_v6, 0.0 }
  0xd9   : > { %v732_v8 = vpack.c.bf16 %v728_v7, %v728_v7 }
  0xda   : > { %v710_v9 = vpop.f32.mrf.mxu2 }
  0xdb   : > { %v723_v10 = vpop.f32.mrf.mxu3  ;;  %1040 = vmatmul.bf16.vlgmr.msra.gmra.mxu3 %v732_v8 }
 0x131   : > { %v1002_v11 = vpop.f32.mrf.mxu0 }
 0x132   : > { %v1003_v14 = vadd.f32 %v1598_v56, %v1002_v11 }
 0x138   : > { %v1015_v12 = vpop.f32.mrf.mxu1 }
 0x139   : > { %v1004_v13 = vpop.f32.mrf.mxu0  ;;  %v1016_v16 = vadd.f32 %v1015_v12, %v1003_v14 }
 0x140   : > { %v1017_v55 = vpop.f32.mrf.mxu1 }
 0x156   : > { %v1028_v15 = vpop.f32.mrf.mxu2 }
 0x157   : > { %v1029_v17 = vadd.f32 %v1028_v15, %v1016_v16 }
 0x15e   : > { %v1041_v18 = vpop.f32.mrf.mxu3  ;;  %v1030_v20 = vpop.f32.mrf.mxu2 }
 0x15f   : > { %v1042_v19 = vadd.f32 %v1041_v18, %v1029_v17 }
 0x161   : > { %1045 = vst [vmem:[%s222_s29] sm:$0xff] %v1042_v19 }
 0x166   : > { %v1043_v21 = vpop.f32.mrf.mxu3 }
 0x167 PF: > { %s15_s18 = sadd.s32 1, %s1605_s18  }
 0x168   : > { %p12_p4 = scmp.ge.s32.totalorder %s15_s18, 4  }
 0x16a   :  { %14 = sbr.rel (!%p12_p4) target bundleno = 1 (0x1), region = 70 }

// kernel: maru_l0_cox_forward.3
= control target key start
LH: loop header
LB: loop body
LE: loop exit
PB: predicated region body
PF: predicated region fallthrough
CT: control target
= control target key end

     0   :  { %vm24_vm0 = vcmask 254976   ;;  %v872_v1 = vmov 0.0   ;;  %vm46_vm1 = vcmask 261120   ;;  %s873_s21 = smov 64   ;;  %s874_s22 = smov 96   ;;  %s1040_s1 = inlined_call_operand.vmem [shape: bf16[32,128], index: 1, kind: input, shape index: {}]   ;;  %s1041_s0 = inlined_call_operand.vmem [shape: f32[8,2,128], index: 0, kind: input, shape index: {}]   ;;  %s1042_s2 = inlined_call_operand.vmem [shape: f32[1,32], index: 2, kind: input, shape index: {}]   ;;  %s1043_s3 = inlined_call_operand.<no memory space> [shape: f32[1,1], index: 3, kind: input, shape index: {}]   ;;  %s1044_s4 = inlined_call_operand.vmem [shape: f32[2,1], index: 4, kind: output, shape index: {}]  }
   0x1   :  { %v788_v0 = vld [vmem:[%s1040_s1 + $0x8] sm:$0xff]  ;;  %25 = vst.msk [vmem:[#allocation2] sm:$0x3] %vm24_vm0, %v872_v1  ;;  %v787_v2 = vld [vmem:[%s1040_s1] sm:$0xff] }
   0x2   :  { %26 = vst.msk [vmem:[#allocation3] sm:$0x3] %vm24_vm0, %v872_v1  ;;  %56 = vmatpush.bf16.msra.mxu0 %v788_v0  ;;  %v27_v5 = vld [vmem:[%s1041_s0] sm:$0x3]  ;;  %v790_v32 = vld [vmem:[%s1040_s1 + $0x8] sm:$0xff] }
   0x3   :  { %138 = vmatpush.bf16.msra.mxu1 %v790_v32  ;;  %v789_v33 = vld [vmem:[%s1040_s1] sm:$0xff]  ;;  %v792_v0 = vld [vmem:[%s1040_s1 + $0x8] sm:$0xff] }
   0x4   :  { %v710_v37 = vld [vmem:[%s1041_s0 + $0x2] sm:$0x3]  ;;  %219 = vmatpush.bf16.msra.mxu2 %v792_v0  ;;  %v794_v32 = vld [vmem:[%s1040_s1 + $0x8] sm:$0xff] }
   0x5   :  { %v791_v1 = vld [vmem:[%s1040_s1] sm:$0xff]  ;;  %300 = vmatpush.bf16.msra.mxu3 %v794_v32 }
   0x6   :  { %57 = vmatpush.bf16.msra.mxu0 %v787_v2 }
   0x7   :  { %139 = vmatpush.bf16.msra.mxu1 %v789_v33  ;;  %v793_v33 = vld [vmem:[%s1040_s1] sm:$0xff] }
   0x8   :  { %v28_v3 = vld [vmem:[#allocation2] sm:$0x3]  ;;  %220 = vmatpush.bf16.msra.mxu2 %v791_v1 }
   0x9   :  { %v29_v4 = vpack.c.bf16 %v28_v3, %v28_v3  ;;  %v84_v25 = vld [vmem:[#allocation3] sm:$0x3]  ;;  %301 = vmatpush.bf16.msra.mxu3 %v793_v33 }
   0xa   :  { %v795_v1 = vld [vmem:[%s1040_s1] sm:$0xff] }
   0xb   :  { %708 = vmatmul.msk.bf16.vlgmr.msra.gmra.mxu0 %vm46_vm1, %v29_v4  ;;  %v797_v33 = vld [vmem:[%s1040_s1] sm:$0xff] }
  0x88   :  { %v59_v6 = vpop.f32.mrf.mxu0 }
  0x89   :  { %v63_v7 = vadd.f32 %v59_v6, %v27_v5  ;;  %v721_v5 = vld [vmem:[%s1041_s0 + $0x4] sm:$0x3] }
  0x8b   :  { %808 = vtanh.f32 %v63_v7  ;;  %v709_v10 = vmul.f32 -1.442695, %v63_v7 }
  0x8d   :  { %810 = vpow2.f32 %v709_v10 }
  0x90   :  { %v61_v8 = vpop.f32.mrf.mxu0 }
  0x91   :  { %v809_v9 = vpop.eup %808 }
  0x92   :  { %87 = vrot.lane.b32.xlu0 %v809_v9, %s873_s21 }
  0x93   :  { %v811_v11 = vpop.eup %810 }
  0x94   :  { %v67_v12 = vadd.f32 1.0, %v811_v11 }
  0x96   :  { %812 = vrcp.f32 %v67_v12  ;;  %v79_v18 = vand.u32 2147483648, %v67_v12  ;;  %vm73_vm3 = vweird.f32 %v67_v12  ;;  %v77_v19 = vand.u32 2147483647, %v67_v12 }
  0x98   :  { %v80_v21 = vor.u32 1.1754944e-38, %v79_v18  ;;  %vm78_vm5 = vcmp.eq.f32.partialorder %v77_v19, 8.507059e+37 }
  0x9c   :  { %v813_v13 = vpop.eup %812 }
  0x9d   :  { %v69_v14 = vmul.f32 %v813_v13, %v67_v12  ;;  %vm74_vm2 = vweird.f32 %v813_v13 }
  0x9e   :  { %vm75_vm4 = vmor %vm73_vm3, %vm74_vm2 }
  0x9f   :  { %v70_v15 = vsub.f32 1.0, %v69_v14 }
  0xa1   :  { %v71_v16 = vmul.f32 %v813_v13, %v70_v15 }
  0xa3   :  { %v72_v17 = vadd.f32 %v813_v13, %v71_v16 }
  0xa5   :  { %v76_v20 = vsel %vm75_vm4, %v813_v13, %v72_v17 }
  0xa6   :  { %v81_v23 = vsel %vm78_vm5, %v80_v21, %v76_v20 }
  0xa7   :  { %v85_v26 = vmul.f32 %v84_v25, %v81_v23 }
 0x104   :  { %v88_v22 = vpop.permute.xlu0 %87 }
 0x105   :  { %v90_v24 = vmul.f32 %v88_v22, %v81_v23 }
 0x107   :  { %92 = vrot.lane.b32.xlu0 %v90_v24, %s874_s22 }
 0x179   :  { %v93_v27 = vpop.permute.xlu0 %92 }
 0x17a   :  { %v95_v28 = vadd.f32 %v93_v27, %v85_v26 }
 0x17c   :  { %814 = vtanh.f32 %v95_v28  ;;  %103 = vst.msk [vmem:[#allocation3] sm:$0x3] %vm24_vm0, %v95_v28 }
 0x182   :  { %v815_v29 = vpop.eup %814 }
 0x183   :  { %98 = vrot.lane.b32.xlu1 %v815_v29, %s873_s21  ;;  %v166_v57 = vld [vmem:[#allocation3] sm:$0x3] }
 0x1f5   :  { %v99_v30 = vpop.permute.xlu1 %98 }
 0x1f6   :  { %v101_v31 = vmul.f32 %v99_v30, %v81_v23 }
 0x1f8   :  { %105 = vrot.lane.b32.xlu1 %v101_v31, %s873_s21 }
 0x26a   :  { %v106_v34 = vpop.permute.xlu1 %105 }
 0x26b   :  { %108 = vst.msk [vmem:[#allocation2] sm:$0x3] %vm24_vm0, %v106_v34 }
 0x272   :  { %v111_v35 = vld [vmem:[#allocation2] sm:$0x3] }
 0x273   :  { %v112_v36 = vpack.c.bf16 %v111_v35, %v111_v35 }
 0x275   :  { %719 = vmatmul.msk.bf16.vlgmr.msra.gmra.mxu1 %vm46_vm1, %v112_v36 }
 0x2f2   :  { %v141_v38 = vpop.f32.mrf.mxu1 }
 0x2f3   :  { %v145_v39 = vadd.f32 %v710_v37, %v141_v38  ;;  %v732_v37 = vld [vmem:[%s1041_s0 + $0x6] sm:$0x3] }
 0x2f5   :  { %816 = vtanh.f32 %v145_v39  ;;  %v720_v42 = vmul.f32 -1.442695, %v145_v39 }
 0x2f7   :  { %818 = vpow2.f32 %v720_v42 }
 0x2fa   :  { %v143_v40 = vpop.f32.mrf.mxu1 }
 0x2fb   :  { %v817_v41 = vpop.eup %816 }
 0x2fc   :  { %169 = vrot.lane.b32.xlu2 %v817_v41, %s873_s21 }
 0x2fd   :  { %v819_v43 = vpop.eup %818 }
 0x2fe   :  { %v149_v44 = vadd.f32 1.0, %v819_v43 }
 0x300   :  { %820 = vrcp.f32 %v149_v44  ;;  %v161_v50 = vand.u32 2147483648, %v149_v44  ;;  %vm155_vm7 = vweird.f32 %v149_v44  ;;  %v159_v51 = vand.u32 2147483647, %v149_v44 }
 0x302   :  { %v162_v53 = vor.u32 1.1754944e-38, %v161_v50  ;;  %vm160_vm9 = vcmp.eq.f32.partialorder %v159_v51, 8.507059e+37 }
 0x306   :  { %v821_v45 = vpop.eup %820 }
 0x307   :  { %v151_v46 = vmul.f32 %v821_v45, %v149_v44  ;;  %vm156_vm6 = vweird.f32 %v821_v45 }
 0x308   :  { %vm157_vm8 = vmor %vm155_vm7, %vm156_vm6 }
 0x309   :  { %v152_v47 = vsub.f32 1.0, %v151_v46 }
 0x30b   :  { %v153_v48 = vmul.f32 %v821_v45, %v152_v47 }
 0x30d   :  { %v154_v49 = vadd.f32 %v821_v45, %v153_v48 }
 0x30f   :  { %v158_v52 = vsel %vm157_vm8, %v821_v45, %v154_v49 }
 0x310   :  { %v163_v55 = vsel %vm160_vm9, %v162_v53, %v158_v52 }
 0x311   :  { %v167_v58 = vmul.f32 %v166_v57, %v163_v55 }
 0x356   :  { %v170_v54 = vpop.permute.xlu2 %169 }
 0x357   :  { %v172_v56 = vmul.f32 %v170_v54, %v163_v55 }
 0x359   :  { %174 = vrot.lane.b32.xlu2 %v172_v56, %s874_s22 }
 0x3b3   :  { %v175_v59 = vpop.permute.xlu2 %174 }
 0x3b4   :  { %v177_v60 = vadd.f32 %v175_v59, %v167_v58 }
 0x3b6   :  { %822 = vtanh.f32 %v177_v60  ;;  %184 = vst.msk [vmem:[#allocation3] sm:$0x3] %vm24_vm0, %v177_v60 }
 0x3bc   :  { %v823_v61 = vpop.eup %822 }
 0x3bd   :  { %180 = vrot.lane.b32.xlu0 %v823_v61, %s873_s21  ;;  %v247_v25 = vld [vmem:[#allocation3] sm:$0x3] }
 0x42f   :  { %v181_v62 = vpop.permute.xlu0 %180 }
 0x430   :  { %v183_v63 = vmul.f32 %v181_v62, %v163_v55  ;;  %v796_v62 = vld [vmem:[%s1040_s1 + $0x8] sm:$0xff] }
 0x431   :  { %381 = vmatpush.bf16.msrb.mxu0 %v796_v62  ;;  %v800_v62 = vld [vmem:[%s1040_s1 + $0x8] sm:$0xff] }
 0x432   :  { %186 = vrot.lane.b32.xlu1 %v183_v63, %s873_s21  ;;  %543 = vmatpush.bf16.msrb.mxu2 %v800_v62 }
 0x435   :  { %382 = vmatpush.bf16.msrb.mxu0 %v795_v1  ;;  %v799_v1 = vld [vmem:[%s1040_s1] sm:$0xff] }
 0x436   :  { %544 = vmatpush.bf16.msrb.mxu2 %v799_v1 }
 0x4a4   :  { %v187_v2 = vpop.permute.xlu1 %186 }
 0x4a5   :  { %189 = vst.msk [vmem:[#allocation2] sm:$0x3] %vm24_vm0, %v187_v2 }
 0x4ac   :  { %v192_v3 = vld [vmem:[#allocation2] sm:$0x3] }
 0x4ad   :  { %v193_v4 = vpack.c.bf16 %v192_v3, %v192_v3 }
 0x4af   :  { %730 = vmatmul.msk.bf16.vlgmr.msra.gmra.mxu2 %vm46_vm1, %v193_v4 }
 0x532   :  { %v222_v6 = vpop.f32.mrf.mxu2 }
 0x533   :  { %v226_v7 = vadd.f32 %v721_v5, %v222_v6  ;;  %v743_v5 = vld [vmem:[%s1041_s0 + $0x8] sm:$0x3] }
 0x535   :  { %824 = vtanh.f32 %v226_v7  ;;  %v731_v10 = vmul.f32 -1.442695, %v226_v7 }
 0x537   :  { %826 = vpow2.f32 %v731_v10 }
 0x53a   :  { %v224_v8 = vpop.f32.mrf.mxu2 }
 0x53b   :  { %v825_v9 = vpop.eup %824 }
 0x53c   :  { %250 = vrot.lane.b32.xlu2 %v825_v9, %s873_s21 }
 0x53d   :  { %v827_v11 = vpop.eup %826 }
 0x53e   :  { %v230_v12 = vadd.f32 1.0, %v827_v11 }
 0x540   :  { %828 = vrcp.f32 %v230_v12  ;;  %v242_v18 = vand.u32 2147483648, %v230_v12  ;;  %vm236_vm11 = vweird.f32 %v230_v12  ;;  %v240_v19 = vand.u32 2147483647, %v230_v12 }
 0x542   :  { %v243_v21 = vor.u32 1.1754944e-38, %v242_v18  ;;  %vm241_vm13 = vcmp.eq.f32.partialorder %v240_v19, 8.507059e+37 }
 0x546   :  { %v829_v13 = vpop.eup %828 }
 0x547   :  { %v232_v14 = vmul.f32 %v829_v13, %v230_v12  ;;  %vm237_vm10 = vweird.f32 %v829_v13 }
 0x548   :  { %vm238_vm12 = vmor %vm236_vm11, %vm237_vm10 }
 0x549   :  { %v233_v15 = vsub.f32 1.0, %v232_v14 }
 0x54b   :  { %v234_v16 = vmul.f32 %v829_v13, %v233_v15 }
 0x54d   :  { %v235_v17 = vadd.f32 %v829_v13, %v234_v16 }
 0x54f   :  { %v239_v20 = vsel %vm238_vm12, %v829_v13, %v235_v17 }
 0x550   :  { %v244_v23 = vsel %vm241_vm13, %v243_v21, %v239_v20 }
 0x551   :  { %v248_v26 = vmul.f32 %v247_v25, %v244_v23 }
 0x596   :  { %v251_v22 = vpop.permute.xlu2 %250 }
 0x597   :  { %v253_v24 = vmul.f32 %v251_v22, %v244_v23 }
 0x599   :  { %255 = vrot.lane.b32.xlu0 %v253_v24, %s874_s22 }
 0x60b   :  { %v256_v27 = vpop.permute.xlu0 %255 }
 0x60c   :  { %v258_v28 = vadd.f32 %v256_v27, %v248_v26 }
 0x60e   :  { %830 = vtanh.f32 %v258_v28  ;;  %265 = vst.msk [vmem:[#allocation3] sm:$0x3] %vm24_vm0, %v258_v28 }
 0x614   :  { %v831_v29 = vpop.eup %830 }
 0x615   :  { %261 = vrot.lane.b32.xlu1 %v831_v29, %s873_s21  ;;  %v328_v57 = vld [vmem:[#allocation3] sm:$0x3] }
 0x687   :  { %v262_v30 = vpop.permute.xlu1 %261 }
 0x688   :  { %v264_v31 = vmul.f32 %v262_v30, %v244_v23  ;;  %v798_v30 = vld [vmem:[%s1040_s1 + $0x8] sm:$0xff] }
 0x689   :  { %462 = vmatpush.bf16.msrb.mxu1 %v798_v30  ;;  %v802_v30 = vld [vmem:[%s1040_s1 + $0x8] sm:$0xff] }
 0x68a   :  { %267 = vrot.lane.b32.xlu2 %v264_v31, %s873_s21  ;;  %624 = vmatpush.bf16.msrb.mxu3 %v802_v30 }
 0x68d   :  { %463 = vmatpush.bf16.msrb.mxu1 %v797_v33  ;;  %v801_v33 = vld [vmem:[%s1040_s1] sm:$0xff] }
 0x68e   :  { %625 = vmatpush.bf16.msrb.mxu3 %v801_v33 }
 0x6e4   :  { %v268_v34 = vpop.permute.xlu2 %267 }
 0x6e5   :  { %270 = vst.msk [vmem:[#allocation2] sm:$0x3] %vm24_vm0, %v268_v34 }
 0x6ec   :  { %v273_v35 = vld [vmem:[#allocation2] sm:$0x3] }
 0x6ed   :  { %v274_v36 = vpack.c.bf16 %v273_v35, %v273_v35 }
 0x6ef   :  { %741 = vmatmul.msk.bf16.vlgmr.msra.gmra.mxu3 %vm46_vm1, %v274_v36 }
 0x772   :  { %v303_v38 = vpop.f32.mrf.mxu3 }
 0x773   :  { %v307_v39 = vadd.f32 %v732_v37, %v303_v38  ;;  %v754_v37 = vld [vmem:[%s1041_s0 + $0xa] sm:$0x3] }
 0x775   :  { %832 = vtanh.f32 %v307_v39  ;;  %v742_v42 = vmul.f32 -1.442695, %v307_v39 }
 0x777   :  { %834 = vpow2.f32 %v742_v42 }
 0x77a   :  { %v305_v40 = vpop.f32.mrf.mxu3 }
 0x77b   :  { %v833_v41 = vpop.eup %832 }
 0x77c   :  { %331 = vrot.lane.b32.xlu0 %v833_v41, %s873_s21 }
 0x77d   :  { %v835_v43 = vpop.eup %834 }
 0x77e   :  { %v311_v44 = vadd.f32 1.0, %v835_v43 }
 0x780   :  { %836 = vrcp.f32 %v311_v44  ;;  %v323_v50 = vand.u32 2147483648, %v311_v44  ;;  %vm317_vm15 = vweird.f32 %v311_v44  ;;  %v321_v51 = vand.u32 2147483647, %v311_v44 }
 0x782   :  { %v324_v53 = vor.u32 1.1754944e-38, %v323_v50  ;;  %vm322_vm3 = vcmp.eq.f32.partialorder %v321_v51, 8.507059e+37 }
 0x786   :  { %v837_v45 = vpop.eup %836 }
 0x787   :  { %v313_v46 = vmul.f32 %v837_v45, %v311_v44  ;;  %vm318_vm14 = vweird.f32 %v837_v45 }
 0x788   :  { %vm319_vm2 = vmor %vm317_vm15, %vm318_vm14 }
 0x789   :  { %v314_v47 = vsub.f32 1.0, %v313_v46 }
 0x78b   :  { %v315_v48 = vmul.f32 %v837_v45, %v314_v47 }
 0x78d   :  { %v316_v49 = vadd.f32 %v837_v45, %v315_v48 }
 0x78f   :  { %v320_v52 = vsel %vm319_vm2, %v837_v45, %v316_v49 }
 0x790   :  { %v325_v55 = vsel %vm322_vm3, %v324_v53, %v320_v52 }
 0x791   :  { %v329_v58 = vmul.f32 %v328_v57, %v325_v55 }
 0x7ee   :  { %v332_v54 = vpop.permute.xlu0 %331 }
 0x7ef   :  { %v334_v56 = vmul.f32 %v332_v54, %v325_v55 }
 0x7f1   :  { %336 = vrot.lane.b32.xlu1 %v334_v56, %s874_s22 }
 0x863   :  { %v337_v59 = vpop.permute.xlu1 %336 }
 0x864   :  { %v339_v60 = vadd.f32 %v337_v59, %v329_v58 }
 0x866   :  { %838 = vtanh.f32 %v339_v60  ;;  %346 = vst.msk [vmem:[#allocation3] sm:$0x3] %vm24_vm0, %v339_v60 }
 0x86c   :  { %v839_v61 = vpop.eup %838 }
 0x86d   :  { %342 = vrot.lane.b32.xlu2 %v839_v61, %s873_s21  ;;  %v409_v25 = vld [vmem:[#allocation3] sm:$0x3] }
 0x8c7   :  { %v343_v63 = vpop.permute.xlu2 %342 }
 0x8c8   :  { %v345_v0 = vmul.f32 %v343_v63, %v325_v55 }
 0x8ca   :  { %348 = vrot.lane.b32.xlu0 %v345_v0, %s873_s21 }
 0x93c   :  { %v349_v2 = vpop.permute.xlu0 %348 }
 0x93d   :  { %351 = vst.msk [vmem:[#allocation2] sm:$0x3] %vm24_vm0, %v349_v2 }
 0x944   :  { %v354_v3 = vld [vmem:[#allocation2] sm:$0x3] }
 0x945   :  { %v355_v4 = vpack.c.bf16 %v354_v3, %v354_v3 }
 0x947   :  { %752 = vmatmul.msk.bf16.vlgmr.msrb.gmra.mxu0 %vm46_vm1, %v355_v4 }
 0x9c4   :  { %v384_v6 = vpop.f32.mrf.mxu0 }
 0x9c5   :  { %v388_v7 = vadd.f32 %v743_v5, %v384_v6  ;;  %v765_v5 = vld [vmem:[%s1041_s0 + $0xc] sm:$0x3] }
 0x9c7   :  { %840 = vtanh.f32 %v388_v7  ;;  %v753_v10 = vmul.f32 -1.442695, %v388_v7 }
 0x9c9   :  { %842 = vpow2.f32 %v753_v10 }
 0x9cc   :  { %v386_v8 = vpop.f32.mrf.mxu0 }
 0x9cd   :  { %v841_v9 = vpop.eup %840 }
 0x9ce   :  { %412 = vrot.lane.b32.xlu1 %v841_v9, %s873_s21 }
 0x9cf   :  { %v843_v11 = vpop.eup %842 }
 0x9d0   :  { %v392_v12 = vadd.f32 1.0, %v843_v11 }
 0x9d2   :  { %844 = vrcp.f32 %v392_v12  ;;  %v404_v18 = vand.u32 2147483648, %v392_v12  ;;  %vm398_vm5 = vweird.f32 %v392_v12  ;;  %v402_v19 = vand.u32 2147483647, %v392_v12 }
 0x9d4   :  { %v405_v21 = vor.u32 1.1754944e-38, %v404_v18  ;;  %vm403_vm7 = vcmp.eq.f32.partialorder %v402_v19, 8.507059e+37 }
 0x9d8   :  { %v845_v13 = vpop.eup %844 }
 0x9d9   :  { %v394_v14 = vmul.f32 %v845_v13, %v392_v12  ;;  %vm399_vm4 = vweird.f32 %v845_v13 }
 0x9da   :  { %vm400_vm6 = vmor %vm398_vm5, %vm399_vm4  ;;  %vm694_vm5 = vcmask 1024  }
 0x9db   :  { %v395_v15 = vsub.f32 1.0, %v394_v14 }
 0x9dd   :  { %v396_v16 = vmul.f32 %v845_v13, %v395_v15 }
 0x9df   :  { %v397_v17 = vadd.f32 %v845_v13, %v396_v16 }
 0x9e1   :  { %v401_v20 = vsel %vm400_vm6, %v845_v13, %v397_v17 }
 0x9e2   :  { %v406_v23 = vsel %vm403_vm7, %v405_v21, %v401_v20 }
 0x9e3   :  { %v410_v26 = vmul.f32 %v409_v25, %v406_v23 }
 0xa40   :  { %v413_v22 = vpop.permute.xlu1 %412 }
 0xa41   :  { %v415_v24 = vmul.f32 %v413_v22, %v406_v23 }
 0xa43   :  { %417 = vrot.lane.b32.xlu2 %v415_v24, %s874_s22 }
 0xa9d   :  { %v418_v27 = vpop.permute.xlu2 %417 }
 0xa9e   :  { %v420_v28 = vadd.f32 %v418_v27, %v410_v26 }
 0xaa0   :  { %846 = vtanh.f32 %v420_v28  ;;  %427 = vst.msk [vmem:[#allocation3] sm:$0x3] %vm24_vm0, %v420_v28 }
 0xaa6   :  { %v847_v29 = vpop.eup %846 }
 0xaa7   :  { %423 = vrot.lane.b32.xlu0 %v847_v29, %s873_s21  ;;  %v490_v57 = vld [vmem:[#allocation3] sm:$0x3] }
 0xb19   :  { %v424_v31 = vpop.permute.xlu0 %423 }
 0xb1a   :  { %v426_v32 = vmul.f32 %v424_v31, %v406_v23 }
 0xb1c   :  { %429 = vrot.lane.b32.xlu1 %v426_v32, %s873_s21 }
 0xb8e   :  { %v430_v34 = vpop.permute.xlu1 %429 }
 0xb8f   :  { %432 = vst.msk [vmem:[#allocation2] sm:$0x3] %vm24_vm0, %v430_v34 }
 0xb96   :  { %v435_v35 = vld [vmem:[#allocation2] sm:$0x3] }
 0xb97   :  { %v436_v36 = vpack.c.bf16 %v435_v35, %v435_v35 }
 0xb99   :  { %763 = vmatmul.msk.bf16.vlgmr.msrb.gmra.mxu1 %vm46_vm1, %v436_v36 }
 0xc16   :  { %v465_v38 = vpop.f32.mrf.mxu1 }
 0xc17   :  { %v469_v39 = vadd.f32 %v754_v37, %v465_v38  ;;  %v776_v37 = vld [vmem:[%s1041_s0 + $0xe] sm:$0x3] }
 0xc19   :  { %848 = vtanh.f32 %v469_v39  ;;  %v764_v42 = vmul.f32 -1.442695, %v469_v39 }
 0xc1b   :  { %850 = vpow2.f32 %v764_v42 }
 0xc1e   :  { %v467_v40 = vpop.f32.mrf.mxu1 }
 0xc1f   :  { %v849_v41 = vpop.eup %848 }
 0xc20   :  { %493 = vrot.lane.b32.xlu2 %v849_v41, %s873_s21 }
 0xc21   :  { %v851_v43 = vpop.eup %850 }
 0xc22   :  { %v473_v44 = vadd.f32 1.0, %v851_v43 }
 0xc24   :  { %852 = vrcp.f32 %v473_v44  ;;  %v485_v50 = vand.u32 2147483648, %v473_v44  ;;  %vm479_vm9 = vweird.f32 %v473_v44  ;;  %v483_v51 = vand.u32 2147483647, %v473_v44 }
 0xc26   :  { %v486_v53 = vor.u32 1.1754944e-38, %v485_v50  ;;  %vm484_vm11 = vcmp.eq.f32.partialorder %v483_v51, 8.507059e+37 }
 0xc2a   :  { %v853_v45 = vpop.eup %852 }
 0xc2b   :  { %v475_v46 = vmul.f32 %v853_v45, %v473_v44  ;;  %vm480_vm8 = vweird.f32 %v853_v45 }
 0xc2c   :  { %vm481_vm10 = vmor %vm479_vm9, %vm480_vm8 }
 0xc2d   :  { %v476_v47 = vsub.f32 1.0, %v475_v46 }
 0xc2f   :  { %v477_v48 = vmul.f32 %v853_v45, %v476_v47 }
 0xc31   :  { %v478_v49 = vadd.f32 %v853_v45, %v477_v48 }
 0xc33   :  { %v482_v52 = vsel %vm481_vm10, %v853_v45, %v478_v49 }
 0xc34   :  { %v487_v55 = vsel %vm484_vm11, %v486_v53, %v482_v52 }
 0xc35   :  { %v491_v58 = vmul.f32 %v490_v57, %v487_v55 }
 0xc7a   :  { %v494_v54 = vpop.permute.xlu2 %493 }
 0xc7b   :  { %v496_v56 = vmul.f32 %v494_v54, %v487_v55 }
 0xc7d   :  { %498 = vrot.lane.b32.xlu0 %v496_v56, %s874_s22 }
 0xcef   :  { %v499_v59 = vpop.permute.xlu0 %498 }
 0xcf0   :  { %v501_v60 = vadd.f32 %v499_v59, %v491_v58 }
 0xcf2   :  { %854 = vtanh.f32 %v501_v60  ;;  %508 = vst.msk [vmem:[#allocation3] sm:$0x3] %vm24_vm0, %v501_v60 }
 0xcf8   :  { %v855_v61 = vpop.eup %854 }
 0xcf9   :  { %504 = vrot.lane.b32.xlu1 %v855_v61, %s873_s21  ;;  %v571_v25 = vld [vmem:[#allocation3] sm:$0x3] }
 0xd6b   :  { %v505_v63 = vpop.permute.xlu1 %504 }
 0xd6c   :  { %v507_v0 = vmul.f32 %v505_v63, %v487_v55 }
 0xd6e   :  { %510 = vrot.lane.b32.xlu2 %v507_v0, %s873_s21  ;;  %v9_v0 = vstv %s1043_s3 }
 0xd6f   :  { %10 = vst [vmem:[#allocation4] sm:$0x1] %v9_v0 }
 0xdc8   :  { %v511_v2 = vpop.permute.xlu2 %510 }
 0xdc9   :  { %513 = vst.msk [vmem:[#allocation2] sm:$0x3] %vm24_vm0, %v511_v2  ;;  %v806_v2 = vld [vmem:[%s1042_s2] ss:$0 sm:$0xff] }
 0xdd0   :  { %v516_v3 = vld [vmem:[#allocation2] sm:$0x3] }
 0xdd1   :  { %v517_v4 = vpack.c.bf16 %v516_v3, %v516_v3 }
 0xdd3   :  { %774 = vmatmul.msk.bf16.vlgmr.msrb.gmra.mxu2 %vm46_vm1, %v517_v4 }
 0xe56   :  { %v546_v6 = vpop.f32.mrf.mxu2 }
 0xe57   :  { %v550_v7 = vadd.f32 %v765_v5, %v546_v6 }
 0xe59   :  { %856 = vtanh.f32 %v550_v7  ;;  %v775_v10 = vmul.f32 -1.442695, %v550_v7  ;;  %v807_v7 = vld [vmem:[#allocation4] ss:$0 sm:$0xff] }
 0xe5b   :  { %858 = vpow2.f32 %v775_v10 }
 0xe5e   :  { %v548_v8 = vpop.f32.mrf.mxu2 }
 0xe5f   :  { %v857_v9 = vpop.eup %856 }
 0xe60   :  { %574 = vrot.lane.b32.xlu0 %v857_v9, %s873_s21 }
 0xe61   :  { %v859_v11 = vpop.eup %858 }
 0xe62   :  { %v554_v12 = vadd.f32 1.0, %v859_v11 }
 0xe64   :  { %860 = vrcp.f32 %v554_v12  ;;  %v566_v18 = vand.u32 2147483648, %v554_v12  ;;  %vm560_vm13 = vweird.f32 %v554_v12  ;;  %v564_v19 = vand.u32 2147483647, %v554_v12 }
 0xe66   :  { %v567_v21 = vor.u32 1.1754944e-38, %v566_v18  ;;  %vm565_vm15 = vcmp.eq.f32.partialorder %v564_v19, 8.507059e+37 }
 0xe6a   :  { %v861_v13 = vpop.eup %860 }
 0xe6b   :  { %v556_v14 = vmul.f32 %v861_v13, %v554_v12  ;;  %vm561_vm12 = vweird.f32 %v861_v13 }
 0xe6c   :  { %vm562_vm14 = vmor %vm560_vm13, %vm561_vm12 }
 0xe6d   :  { %v557_v15 = vsub.f32 1.0, %v556_v14 }
 0xe6f   :  { %v558_v16 = vmul.f32 %v861_v13, %v557_v15 }
 0xe71   :  { %v559_v17 = vadd.f32 %v861_v13, %v558_v16 }
 0xe73   :  { %v563_v20 = vsel %vm562_vm14, %v861_v13, %v559_v17 }
 0xe74   :  { %v568_v23 = vsel %vm565_vm15, %v567_v21, %v563_v20 }
 0xe75   :  { %v572_v26 = vmul.f32 %v571_v25, %v568_v23 }
 0xed2   :  { %v575_v22 = vpop.permute.xlu0 %574 }
 0xed3   :  { %v577_v24 = vmul.f32 %v575_v22, %v568_v23 }
 0xed5   :  { %579 = vrot.lane.b32.xlu1 %v577_v24, %s874_s22 }
 0xf47   :  { %v580_v27 = vpop.permute.xlu1 %579 }
 0xf48   :  { %v582_v28 = vadd.f32 %v580_v27, %v572_v26 }
 0xf4a   :  { %862 = vtanh.f32 %v582_v28  ;;  %589 = vst.msk [vmem:[#allocation3] sm:$0x3] %vm24_vm0, %v582_v28 }
 0xf50   :  { %v863_v29 = vpop.eup %862 }
 0xf51   :  { %585 = vrot.lane.b32.xlu2 %v863_v29, %s873_s21  ;;  %v652_v57 = vld [vmem:[#allocation3] sm:$0x3] }
 0xfab   :  { %v586_v31 = vpop.permute.xlu2 %585 }
 0xfac   :  { %v588_v32 = vmul.f32 %v586_v31, %v568_v23 }
 0xfae   :  { %591 = vrot.lane.b32.xlu0 %v588_v32, %s873_s21 }
0x1020   :  { %v592_v34 = vpop.permute.xlu0 %591 }
0x1021   :  { %594 = vst.msk [vmem:[#allocation2] sm:$0x3] %vm24_vm0, %v592_v34 }
0x1028   :  { %v597_v35 = vld [vmem:[#allocation2] sm:$0x3] }
0x1029   :  { %v598_v36 = vpack.c.bf16 %v597_v35, %v597_v35 }
0x102b   :  { %785 = vmatmul.msk.bf16.vlgmr.msrb.gmra.mxu3 %vm46_vm1, %v598_v36 }
0x10ae   :  { %v627_v38 = vpop.f32.mrf.mxu3 }
0x10af   :  { %v631_v39 = vadd.f32 %v776_v37, %v627_v38 }
0x10b1   :  { %864 = vtanh.f32 %v631_v39  ;;  %v786_v42 = vmul.f32 -1.442695, %v631_v39 }
0x10b3   :  { %866 = vpow2.f32 %v786_v42 }
0x10b6   :  { %v629_v40 = vpop.f32.mrf.mxu3 }
0x10b7   :  { %v865_v41 = vpop.eup %864 }
0x10b8   :  { %655 = vrot.lane.b32.xlu1 %v865_v41, %s873_s21 }
0x10b9   :  { %v867_v43 = vpop.eup %866 }
0x10ba   :  { %v635_v44 = vadd.f32 1.0, %v867_v43 }
0x10bc   :  { %868 = vrcp.f32 %v635_v44  ;;  %v647_v50 = vand.u32 2147483648, %v635_v44  ;;  %vm641_vm2 = vweird.f32 %v635_v44  ;;  %v645_v51 = vand.u32 2147483647, %v635_v44 }
0x10be   :  { %v648_v53 = vor.u32 1.1754944e-38, %v647_v50  ;;  %vm646_vm4 = vcmp.eq.f32.partialorder %v645_v51, 8.507059e+37 }
0x10c2   :  { %v869_v45 = vpop.eup %868 }
0x10c3   :  { %v637_v46 = vmul.f32 %v869_v45, %v635_v44  ;;  %vm642_vm1 = vweird.f32 %v869_v45 }
0x10c4   :  { %vm643_vm3 = vmor %vm641_vm2, %vm642_vm1 }
0x10c5   :  { %v638_v47 = vsub.f32 1.0, %v637_v46 }
0x10c7   :  { %v639_v48 = vmul.f32 %v869_v45, %v638_v47 }
0x10c9   :  { %v640_v49 = vadd.f32 %v869_v45, %v639_v48 }
0x10cb   :  { %v644_v52 = vsel %vm643_vm3, %v869_v45, %v640_v49 }
0x10cc   :  { %v649_v55 = vsel %vm646_vm4, %v648_v53, %v644_v52 }
0x10cd   :  { %v653_v58 = vmul.f32 %v652_v57, %v649_v55 }
0x112a   :  { %v656_v54 = vpop.permute.xlu1 %655 }
0x112b   :  { %v658_v56 = vmul.f32 %v656_v54, %v649_v55 }
0x112d   :  { %660 = vrot.lane.b32.xlu2 %v658_v56, %s874_s22 }
0x1187   :  { %v661_v59 = vpop.permute.xlu2 %660 }
0x1188   :  { %v663_v60 = vadd.f32 %v661_v59, %v653_v58 }
0x118a   :  { %870 = vtanh.f32 %v663_v60  ;;  %670 = vst.msk [vmem:[#allocation3] sm:$0x3] %vm24_vm0, %v663_v60 }
0x1190   :  { %v871_v61 = vpop.eup %870 }
0x1191   :  { %666 = vrot.lane.b32.xlu0 %v871_v61, %s873_s21 }
0x1203   :  { %v667_v62 = vpop.permute.xlu0 %666 }
0x1204   :  { %v669_v63 = vmul.f32 %v667_v62, %v649_v55 }
0x1206   :  { %672 = vrot.lane.b32.xlu1 %v669_v63, %s873_s21 }
0x1278   :  { %v673_v1 = vpop.permute.xlu1 %672 }
0x1279   :  { %675 = vst.msk [vmem:[#allocation2] sm:$0x3] %vm24_vm0, %v673_v1 }
0x1280   :  { %v679_v3 = vld [vmem:[#allocation2] sm:$0x3] }
0x1281   :  { %v680_v4 = vmax.f32 %v679_v3, 0.0 }
0x1283   :  { %v685_v5 = vmul.f32 %v806_v2, %v680_v4 }
0x1285   :  { %v686_v6 = vsel %vm24_vm0, %v685_v5, 0.0 }
0x1286   :  { %687 = vadd.xlane.f32.xlu2 %v686_v6 }
0x12f9   :  { %v688_v8 = vpop.xlane.xlu2 %687 }
0x12fa   :  { %v693_v9 = vadd.f32 %v807_v7, %v688_v8 }
0x12fc   :  { %695 = vst.msk [vmem:[%s1044_s4] sm:$0x3] %vm694_vm5, %v693_v9 }

</bundles_post_ra>
